<compile_context>
chip_gen: v6e
topology: v6e:2x2x1
jax: 0.10.0
libtpu: 0.0.40
codegen_flags: <defaults>
</compile_context>

<pallas_src>
import jax
import jax.numpy as jnp
from jax.experimental import pallas as pl
from jax.experimental.pallas import tpu as pltpu

# ---- small config (consistent with LSTNet args) -----------------------------
BATCH = 2
P     = 16   # seq_len
M     = 8    # input_size
HID_C = 16   # hidCNN
HID_R = 32   # hidRNN
HID_S = 8    # hidSkip
CK    = 3    # CNN_kernel
SKIP  = 2    # skip
HW    = 4    # highway_window

T      = P - CK + 1            # conv output length
PT     = (P - CK) // SKIP      # self.pt  (int(...) in PyTorch)
OFFSET = T - PT * SKIP         # start of the skip slice along time


# ---- Pallas kernel -----------------------------------------------------------
def lstnet_kernel(xwin_ref,                     # (T*B, CK*M)        VMEM  (im2col)
                  convw_ref, convb_ref,         # (CK*M, HID_C), (1, HID_C)
                  g1wx_ref, g1wh_ref,           # (HID_C, 3*HID_R), (HID_R, 3*HID_R)
                  g1bx_ref, g1bh_ref,           # (B, 3*HID_R) pre-broadcast
                  gswx_ref, gswh_ref,           # (HID_C, 3*HID_S), (HID_S, 3*HID_S)
                  gsbx_ref, gsbh_ref,           # (B*SKIP, 3*HID_S) pre-broadcast
                  w1_ref, b1_ref,               # (HID_R + SKIP*HID_S, M), (1, M)
                  xhw_ref,                      # (B, HW, M)
                  hww_ref, hwb_ref,             # (1, HW), (1, 1)  in SMEM
                  out_ref):                     # (B, 1, M)          VMEM

    # ---------------- Conv1d + ReLU as one im2col matmul ----------------------
    # c_all[t*B + b, o] = relu(bias[o] + sum_{k,i} x[b, t+k, i] * W[o, i, k])
    c_all = jnp.maximum(
        jnp.dot(xwin_ref[...], convw_ref[...],
                preferred_element_type=jnp.float32) + convb_ref[...],
        0.0)                                                       # (T*B, HID_C)

    # ---------------- Fused-gate GRU step (PyTorch gate order r,z,n) ----------
    def gru_step(x_t, h, wx, wh, bx, bh, H):
        gx = jnp.dot(x_t, wx, preferred_element_type=jnp.float32) + bx
        gh = jnp.dot(h,  wh, preferred_element_type=jnp.float32) + bh
        r = jax.nn.sigmoid(gx[:, 0 * H:1 * H] + gh[:, 0 * H:1 * H])
        z = jax.nn.sigmoid(gx[:, 1 * H:2 * H] + gh[:, 1 * H:2 * H])
        n = jnp.tanh(gx[:, 2 * H:3 * H] + r * gh[:, 2 * H:3 * H])
        return (1.0 - z) * n + z * h

    # ---------------- GRU1 over all T steps (fully unrolled) ------------------
    g1_wx = g1wx_ref[...]; g1_wh = g1wh_ref[...]
    g1_bx = g1bx_ref[...]; g1_bh = g1bh_ref[...]
    h_r = jnp.zeros((BATCH, HID_R), jnp.float32)
    for t in range(T):
        x_t = c_all[t * BATCH:(t + 1) * BATCH, :]                  # static slice
        h_r = gru_step(x_t, h_r, g1_wx, g1_wh, g1_bx, g1_bh, HID_R)

    # ---------------- Skip GRU: SKIP phases merged into one batch -------------
    # At step p the SKIP phases use consecutive conv times, so their rows are a
    # contiguous static slice of c_all; merged row order is (j, b) with j major.
    gs_wx = gswx_ref[...]; gs_wh = gswh_ref[...]
    gs_bx = gsbx_ref[...]; gs_bh = gsbh_ref[...]
    h_s = jnp.zeros((BATCH * SKIP, HID_S), jnp.float32)
    for p in range(PT):
        base = (OFFSET + p * SKIP) * BATCH
        x_t = c_all[base: base + BATCH * SKIP, :]                  # static slice
        h_s = gru_step(x_t, h_s, gs_wx, gs_wh, gs_bx, gs_bh, HID_S)

    # ---------------- linear1 on cat([r, s_0, .., s_{skip-1}]) ----------------
    feat = jnp.concatenate(
        [h_r] + [h_s[j * BATCH:(j + 1) * BATCH, :] for j in range(SKIP)],
        axis=1)                                                    # (B, HID_R + SKIP*HID_S)
    res = jnp.dot(feat, w1_ref[...],
                  preferred_element_type=jnp.float32) + b1_ref[...]

    # ---------------- highway: Linear(hw -> 1) per (batch, channel) -----------
    z_hw = jnp.zeros((BATCH, M), jnp.float32) + hwb_ref[0, 0]
    for t in range(HW):
        z_hw = z_hw + xhw_ref[:, t, :] * hww_ref[0, t]

    out_ref[:, 0, :] = res + z_hw                                  # (B, 1, M)


# ---- wrapper: fold/fuse params and build im2col, then call the kernel ---------
def lstnet_forward(x, params):
    # im2col of the conv input: row t*B + b = x[b, t:t+CK, :] flattened (k major).
    x_win = jnp.stack(
        [x[:, t:t + CK, :].reshape(BATCH, CK * M) for t in range(T)],
        axis=0).reshape(T * BATCH, CK * M)
    x_hw = x[:, P - HW:P, :]                                       # (B, HW, M)

    conv_w = params["conv_w"].reshape(CK * M, HID_C)
    conv_b = params["conv_b"]                                      # (1, HID_C)

    def fuse_gates(wx, wh, bx, bh, batch_rows, hid):
        wx_all = jnp.concatenate([wx[i] for i in range(3)], axis=1)   # (in, 3*hid)
        wh_all = jnp.concatenate([wh[i] for i in range(3)], axis=1)   # (hid, 3*hid)
        bx_all = jnp.broadcast_to(
            jnp.concatenate([bx[i] for i in range(3)], axis=1), (batch_rows, 3 * hid))
        bh_all = jnp.broadcast_to(
            jnp.concatenate([bh[i] for i in range(3)], axis=1), (batch_rows, 3 * hid))
        return wx_all, wh_all, bx_all, bh_all

    g1_wx, g1_wh, g1_bx, g1_bh = fuse_gates(
        params["g1_wx"], params["g1_wh"], params["g1_bx"], params["g1_bh"],
        BATCH, HID_R)
    gs_wx, gs_wh, gs_bx, gs_bh = fuse_gates(
        params["gs_wx"], params["gs_wh"], params["gs_bx"], params["gs_bh"],
        BATCH * SKIP, HID_S)

    w1_all = jnp.concatenate(
        [params["w1_r"]] + [params["w1_s"][j] for j in range(SKIP)], axis=0)
    b1 = params["b1"]

    vmem = pl.BlockSpec(memory_space=pltpu.MemorySpace.VMEM)
    smem = pl.BlockSpec(memory_space=pltpu.MemorySpace.SMEM)
    in_specs = [vmem] * 14 + [smem, smem]      # highway scalars live in SMEM

    # TODO(synk): at production batch sizes add a "parallel" batch grid axis
    # (dimension_semantics) so v7x's 2 TensorCores are both used; at BATCH=2 it
    # would be a no-op so the kernel stays gridless here.
    return pl.pallas_call(
        lstnet_kernel,
        out_shape=jax.ShapeDtypeStruct((BATCH, 1, M), jnp.float32),
        in_specs=in_specs,
        out_specs=vmem,
    )(x_win, conv_w, conv_b,
      g1_wx, g1_wh, g1_bx, g1_bh,
      gs_wx, gs_wh, gs_bx, gs_bh,
      w1_all, b1,
      x_hw,
      params["hw_w"], params["hw_b"])


lstnet_forward_jit = jax.jit(lstnet_forward)


# ---- pure-JAX reference (original, unfused parameterization) ------------------
def lstnet_ref(x, p):
    c = jnp.stack(
        [jax.nn.relu(sum(x[:, t + k, :] @ p["conv_w"][k] for k in range(CK))
                     + p["conv_b"][0]) for t in range(T)], axis=0)   # (T,B,HID_C)

    def gru(seq, wx, wh, bx, bh, hid):
        h = jnp.zeros((seq.shape[1], hid), jnp.float32)
        for t in range(seq.shape[0]):
            x_t = seq[t]
            r = jax.nn.sigmoid(x_t @ wx[0] + bx[0] + h @ wh[0] + bh[0])
            z = jax.nn.sigmoid(x_t @ wx[1] + bx[1] + h @ wh[1] + bh[1])
            n = jnp.tanh(x_t @ wx[2] + bx[2] + r * (h @ wh[2] + bh[2]))
            h = (1.0 - z) * n + z * h
        return h

    r = gru(c, p["g1_wx"], p["g1_wh"], p["g1_bx"], p["g1_bh"], HID_R)
    res = r @ p["w1_r"] + p["b1"]
    for j in range(SKIP):
        seq_j = jnp.stack([c[OFFSET + pp * SKIP + j] for pp in range(PT)], 0)
        s_j = gru(seq_j, p["gs_wx"], p["gs_wh"], p["gs_bx"], p["gs_bh"], HID_S)
        res = res + s_j @ p["w1_s"][j]
    z_hw = sum(x[:, P - HW + t, :] * p["hw_w"][0, t] for t in range(HW)) + p["hw_b"][0, 0]
    return (res + z_hw)[:, None, :]


if __name__ == "__main__":
    key = jax.random.PRNGKey(0)
    ks = jax.random.split(key, 16)

    def init(k, shape, scale=0.1):
        return (scale * jax.random.normal(k, shape)).astype(jnp.float32)

    params = {
        "conv_w": init(ks[0], (CK, M, HID_C)),        # Conv1d weight, (Ck, in, out) layout
        "conv_b": init(ks[1], (1, HID_C)),
        "g1_wx": init(ks[2], (3, HID_C, HID_R)),      # GRU1 W_i{r,z,n}^T stacked
        "g1_wh": init(ks[3], (3, HID_R, HID_R)),
        "g1_bx": init(ks[4], (3, 1, HID_R)),
        "g1_bh": init(ks[5], (3, 1, HID_R)),
        "gs_wx": init(ks[6], (3, HID_C, HID_S)),      # GRUskip
        "gs_wh": init(ks[7], (3, HID_S, HID_S)),
        "gs_bx": init(ks[8], (3, 1, HID_S)),
        "gs_bh": init(ks[9], (3, 1, HID_S)),
        "w1_r": init(ks[10], (HID_R, M)),             # linear1 columns for r
        "w1_s": init(ks[11], (SKIP, HID_S, M)),       # linear1 columns per skip phase
        "b1":   init(ks[12], (1, M)),
        "hw_w": init(ks[13], (1, HW)),                # highway Linear(hw, 1)
        "hw_b": init(ks[14], (1, 1)),
    }
    x = jax.random.normal(ks[15], (BATCH, P, M), dtype=jnp.float32)

    out = jax.block_until_ready(lstnet_forward_jit(x, params))
    ref = jax.block_until_ready(lstnet_ref(x, params))

    assert out.shape == (BATCH, 1, M), out.shape
    assert jnp.allclose(out, ref, rtol=1e-4, atol=1e-4), (out, ref)
    print("KERNEL_OK")
</pallas_src>

<mosaic_0001>
module attributes {stable_mosaic.version = 11 : i64} {
  func.func @lstnet_kernel(%arg0: memref<28x24xf32, #tpu.memory_space<vmem>>, %arg1: memref<24x16xf32, #tpu.memory_space<vmem>>, %arg2: memref<1x16xf32, #tpu.memory_space<vmem>>, %arg3: memref<16x96xf32, #tpu.memory_space<vmem>>, %arg4: memref<32x96xf32, #tpu.memory_space<vmem>>, %arg5: memref<2x96xf32, #tpu.memory_space<vmem>>, %arg6: memref<2x96xf32, #tpu.memory_space<vmem>>, %arg7: memref<16x24xf32, #tpu.memory_space<vmem>>, %arg8: memref<8x24xf32, #tpu.memory_space<vmem>>, %arg9: memref<4x24xf32, #tpu.memory_space<vmem>>, %arg10: memref<4x24xf32, #tpu.memory_space<vmem>>, %arg11: memref<48x8xf32, #tpu.memory_space<vmem>>, %arg12: memref<1x8xf32, #tpu.memory_space<vmem>>, %arg13: memref<2x4x8xf32, #tpu.memory_space<vmem>>, %arg14: memref<1x4xf32, #tpu.memory_space<smem>>, %arg15: memref<1x1xf32, #tpu.memory_space<smem>>, %arg16: memref<2x1x8xf32, #tpu.memory_space<vmem>>) attributes {dimension_semantics = [], scalar_prefetch = 0 : i64, scratch_operands = 0 : i64, tpu.core_type = #tpu.core_type<tc>} {
    %c0 = arith.constant 0 : index
    %c0_0 = arith.constant 0 : index
    %0 = vector.load %arg0[%c0, %c0_0] : memref<28x24xf32, #tpu.memory_space<vmem>>, vector<28x24xf32>
    %c0_1 = arith.constant 0 : index
    %c0_2 = arith.constant 0 : index
    %1 = vector.load %arg1[%c0_1, %c0_2] : memref<24x16xf32, #tpu.memory_space<vmem>>, vector<24x16xf32>
    %cst = arith.constant dense<0.000000e+00> : vector<28x16xf32>
    %2 = tpu.matmul %0, %1, %cst {dimension_numbers = #tpu.dot_dimension_numbers<[1], [0], [0], [1], [0, 0, 1, 1], [], []>} : vector<28x24xf32>, vector<24x16xf32>, vector<28x16xf32> -> vector<28x16xf32>
    %c0_3 = arith.constant 0 : index
    %c0_4 = arith.constant 0 : index
    %3 = vector.load %arg2[%c0_3, %c0_4] : memref<1x16xf32, #tpu.memory_space<vmem>>, vector<1x16xf32>
    %4 = vector.broadcast %3 : vector<1x16xf32> to vector<28x16xf32>
    %5 = arith.addf %2, %4 : vector<28x16xf32>
    %cst_5 = arith.constant 0.000000e+00 : f32
    %6 = vector.broadcast %cst_5 : f32 to vector<28x16xf32>
    %7 = arith.maximumf %5, %6 : vector<28x16xf32>
    %c0_6 = arith.constant 0 : index
    %c0_7 = arith.constant 0 : index
    %8 = vector.load %arg3[%c0_6, %c0_7] : memref<16x96xf32, #tpu.memory_space<vmem>>, vector<16x96xf32>
    %c0_8 = arith.constant 0 : index
    %c0_9 = arith.constant 0 : index
    %9 = vector.load %arg4[%c0_8, %c0_9] : memref<32x96xf32, #tpu.memory_space<vmem>>, vector<32x96xf32>
    %c0_10 = arith.constant 0 : index
    %c0_11 = arith.constant 0 : index
    %10 = vector.load %arg5[%c0_10, %c0_11] : memref<2x96xf32, #tpu.memory_space<vmem>>, vector<2x96xf32>
    %c0_12 = arith.constant 0 : index
    %c0_13 = arith.constant 0 : index
    %11 = vector.load %arg6[%c0_12, %c0_13] : memref<2x96xf32, #tpu.memory_space<vmem>>, vector<2x96xf32>
    %cst_14 = arith.constant 0.000000e+00 : f32
    %12 = vector.broadcast %cst_14 : f32 to vector<2x32xf32>
    %13 = vector.extract_strided_slice %7 {offsets = [0, 0], sizes = [2, 16], strides = [1, 1]} : vector<28x16xf32> to vector<2x16xf32>
    %cst_15 = arith.constant dense<0.000000e+00> : vector<2x96xf32>
    %14 = tpu.matmul %13, %8, %cst_15 {dimension_numbers = #tpu.dot_dimension_numbers<[1], [0], [0], [1], [0, 0, 1, 1], [], []>} : vector<2x16xf32>, vector<16x96xf32>, vector<2x96xf32> -> vector<2x96xf32>
    %15 = arith.addf %14, %10 : vector<2x96xf32>
    %cst_16 = arith.constant dense<0.000000e+00> : vector<2x96xf32>
    %16 = tpu.matmul %12, %9, %cst_16 {dimension_numbers = #tpu.dot_dimension_numbers<[1], [0], [0], [1], [0, 0, 1, 1], [], []>} : vector<2x32xf32>, vector<32x96xf32>, vector<2x96xf32> -> vector<2x96xf32>
    %17 = arith.addf %16, %11 : vector<2x96xf32>
    %18 = vector.extract_strided_slice %15 {offsets = [0, 0], sizes = [2, 32], strides = [1, 1]} : vector<2x96xf32> to vector<2x32xf32>
    %19 = vector.extract_strided_slice %17 {offsets = [0, 0], sizes = [2, 32], strides = [1, 1]} : vector<2x96xf32> to vector<2x32xf32>
    %20 = arith.addf %18, %19 : vector<2x32xf32>
    %21 = arith.negf %20 : vector<2x32xf32>
    %22 = math.exp %21 : vector<2x32xf32>
    %cst_17 = arith.constant 1.000000e+00 : f32
    %23 = vector.broadcast %cst_17 : f32 to vector<2x32xf32>
    %24 = arith.addf %23, %22 : vector<2x32xf32>
    %25 = arith.divf %23, %24 : vector<2x32xf32>
    %26 = vector.extract_strided_slice %15 {offsets = [0, 32], sizes = [2, 32], strides = [1, 1]} : vector<2x96xf32> to vector<2x32xf32>
    %27 = vector.extract_strided_slice %17 {offsets = [0, 32], sizes = [2, 32], strides = [1, 1]} : vector<2x96xf32> to vector<2x32xf32>
    %28 = arith.addf %26, %27 : vector<2x32xf32>
    %29 = arith.negf %28 : vector<2x32xf32>
    %30 = math.exp %29 : vector<2x32xf32>
    %cst_18 = arith.constant 1.000000e+00 : f32
    %31 = vector.broadcast %cst_18 : f32 to vector<2x32xf32>
    %32 = arith.addf %31, %30 : vector<2x32xf32>
    %33 = arith.divf %31, %32 : vector<2x32xf32>
    %34 = vector.extract_strided_slice %15 {offsets = [0, 64], sizes = [2, 32], strides = [1, 1]} : vector<2x96xf32> to vector<2x32xf32>
    %35 = vector.extract_strided_slice %17 {offsets = [0, 64], sizes = [2, 32], strides = [1, 1]} : vector<2x96xf32> to vector<2x32xf32>
    %36 = arith.mulf %25, %35 : vector<2x32xf32>
    %37 = arith.addf %34, %36 : vector<2x32xf32>
    %38 = math.tanh %37 : vector<2x32xf32>
    %cst_19 = arith.constant 1.000000e+00 : f32
    %39 = vector.broadcast %cst_19 : f32 to vector<2x32xf32>
    %40 = arith.subf %39, %33 : vector<2x32xf32>
    %41 = arith.mulf %40, %38 : vector<2x32xf32>
    %42 = arith.mulf %33, %12 : vector<2x32xf32>
    %43 = arith.addf %41, %42 : vector<2x32xf32>
    %44 = vector.extract_strided_slice %7 {offsets = [2, 0], sizes = [2, 16], strides = [1, 1]} : vector<28x16xf32> to vector<2x16xf32>
    %cst_20 = arith.constant dense<0.000000e+00> : vector<2x96xf32>
    %45 = tpu.matmul %44, %8, %cst_20 {dimension_numbers = #tpu.dot_dimension_numbers<[1], [0], [0], [1], [0, 0, 1, 1], [], []>} : vector<2x16xf32>, vector<16x96xf32>, vector<2x96xf32> -> vector<2x96xf32>
    %46 = arith.addf %45, %10 : vector<2x96xf32>
    %cst_21 = arith.constant dense<0.000000e+00> : vector<2x96xf32>
    %47 = tpu.matmul %43, %9, %cst_21 {dimension_numbers = #tpu.dot_dimension_numbers<[1], [0], [0], [1], [0, 0, 1, 1], [], []>} : vector<2x32xf32>, vector<32x96xf32>, vector<2x96xf32> -> vector<2x96xf32>
    %48 = arith.addf %47, %11 : vector<2x96xf32>
    %49 = vector.extract_strided_slice %46 {offsets = [0, 0], sizes = [2, 32], strides = [1, 1]} : vector<2x96xf32> to vector<2x32xf32>
    %50 = vector.extract_strided_slice %48 {offsets = [0, 0], sizes = [2, 32], strides = [1, 1]} : vector<2x96xf32> to vector<2x32xf32>
    %51 = arith.addf %49, %50 : vector<2x32xf32>
    %52 = arith.negf %51 : vector<2x32xf32>
    %53 = math.exp %52 : vector<2x32xf32>
    %cst_22 = arith.constant 1.000000e+00 : f32
    %54 = vector.broadcast %cst_22 : f32 to vector<2x32xf32>
    %55 = arith.addf %54, %53 : vector<2x32xf32>
    %56 = arith.divf %54, %55 : vector<2x32xf32>
    %57 = vector.extract_strided_slice %46 {offsets = [0, 32], sizes = [2, 32], strides = [1, 1]} : vector<2x96xf32> to vector<2x32xf32>
    %58 = vector.extract_strided_slice %48 {offsets = [0, 32], sizes = [2, 32], strides = [1, 1]} : vector<2x96xf32> to vector<2x32xf32>
    %59 = arith.addf %57, %58 : vector<2x32xf32>
    %60 = arith.negf %59 : vector<2x32xf32>
    %61 = math.exp %60 : vector<2x32xf32>
    %cst_23 = arith.constant 1.000000e+00 : f32
    %62 = vector.broadcast %cst_23 : f32 to vector<2x32xf32>
    %63 = arith.addf %62, %61 : vector<2x32xf32>
    %64 = arith.divf %62, %63 : vector<2x32xf32>
    %65 = vector.extract_strided_slice %46 {offsets = [0, 64], sizes = [2, 32], strides = [1, 1]} : vector<2x96xf32> to vector<2x32xf32>
    %66 = vector.extract_strided_slice %48 {offsets = [0, 64], sizes = [2, 32], strides = [1, 1]} : vector<2x96xf32> to vector<2x32xf32>
    %67 = arith.mulf %56, %66 : vector<2x32xf32>
    %68 = arith.addf %65, %67 : vector<2x32xf32>
    %69 = math.tanh %68 : vector<2x32xf32>
    %cst_24 = arith.constant 1.000000e+00 : f32
    %70 = vector.broadcast %cst_24 : f32 to vector<2x32xf32>
    %71 = arith.subf %70, %64 : vector<2x32xf32>
    %72 = arith.mulf %71, %69 : vector<2x32xf32>
    %73 = arith.mulf %64, %43 : vector<2x32xf32>
    %74 = arith.addf %72, %73 : vector<2x32xf32>
    %75 = vector.extract_strided_slice %7 {offsets = [4, 0], sizes = [2, 16], strides = [1, 1]} : vector<28x16xf32> to vector<2x16xf32>
    %cst_25 = arith.constant dense<0.000000e+00> : vector<2x96xf32>
    %76 = tpu.matmul %75, %8, %cst_25 {dimension_numbers = #tpu.dot_dimension_numbers<[1], [0], [0], [1], [0, 0, 1, 1], [], []>} : vector<2x16xf32>, vector<16x96xf32>, vector<2x96xf32> -> vector<2x96xf32>
    %77 = arith.addf %76, %10 : vector<2x96xf32>
    %cst_26 = arith.constant dense<0.000000e+00> : vector<2x96xf32>
    %78 = tpu.matmul %74, %9, %cst_26 {dimension_numbers = #tpu.dot_dimension_numbers<[1], [0], [0], [1], [0, 0, 1, 1], [], []>} : vector<2x32xf32>, vector<32x96xf32>, vector<2x96xf32> -> vector<2x96xf32>
    %79 = arith.addf %78, %11 : vector<2x96xf32>
    %80 = vector.extract_strided_slice %77 {offsets = [0, 0], sizes = [2, 32], strides = [1, 1]} : vector<2x96xf32> to vector<2x32xf32>
    %81 = vector.extract_strided_slice %79 {offsets = [0, 0], sizes = [2, 32], strides = [1, 1]} : vector<2x96xf32> to vector<2x32xf32>
    %82 = arith.addf %80, %81 : vector<2x32xf32>
    %83 = arith.negf %82 : vector<2x32xf32>
    %84 = math.exp %83 : vector<2x32xf32>
    %cst_27 = arith.constant 1.000000e+00 : f32
    %85 = vector.broadcast %cst_27 : f32 to vector<2x32xf32>
    %86 = arith.addf %85, %84 : vector<2x32xf32>
    %87 = arith.divf %85, %86 : vector<2x32xf32>
    %88 = vector.extract_strided_slice %77 {offsets = [0, 32], sizes = [2, 32], strides = [1, 1]} : vector<2x96xf32> to vector<2x32xf32>
    %89 = vector.extract_strided_slice %79 {offsets = [0, 32], sizes = [2, 32], strides = [1, 1]} : vector<2x96xf32> to vector<2x32xf32>
    %90 = arith.addf %88, %89 : vector<2x32xf32>
    %91 = arith.negf %90 : vector<2x32xf32>
    %92 = math.exp %91 : vector<2x32xf32>
    %cst_28 = arith.constant 1.000000e+00 : f32
    %93 = vector.broadcast %cst_28 : f32 to vector<2x32xf32>
    %94 = arith.addf %93, %92 : vector<2x32xf32>
    %95 = arith.divf %93, %94 : vector<2x32xf32>
    %96 = vector.extract_strided_slice %77 {offsets = [0, 64], sizes = [2, 32], strides = [1, 1]} : vector<2x96xf32> to vector<2x32xf32>
    %97 = vector.extract_strided_slice %79 {offsets = [0, 64], sizes = [2, 32], strides = [1, 1]} : vector<2x96xf32> to vector<2x32xf32>
    %98 = arith.mulf %87, %97 : vector<2x32xf32>
    %99 = arith.addf %96, %98 : vector<2x32xf32>
    %100 = math.tanh %99 : vector<2x32xf32>
    %cst_29 = arith.constant 1.000000e+00 : f32
    %101 = vector.broadcast %cst_29 : f32 to vector<2x32xf32>
    %102 = arith.subf %101, %95 : vector<2x32xf32>
    %103 = arith.mulf %102, %100 : vector<2x32xf32>
    %104 = arith.mulf %95, %74 : vector<2x32xf32>
    %105 = arith.addf %103, %104 : vector<2x32xf32>
    %106 = vector.extract_strided_slice %7 {offsets = [6, 0], sizes = [2, 16], strides = [1, 1]} : vector<28x16xf32> to vector<2x16xf32>
    %cst_30 = arith.constant dense<0.000000e+00> : vector<2x96xf32>
    %107 = tpu.matmul %106, %8, %cst_30 {dimension_numbers = #tpu.dot_dimension_numbers<[1], [0], [0], [1], [0, 0, 1, 1], [], []>} : vector<2x16xf32>, vector<16x96xf32>, vector<2x96xf32> -> vector<2x96xf32>
    %108 = arith.addf %107, %10 : vector<2x96xf32>
    %cst_31 = arith.constant dense<0.000000e+00> : vector<2x96xf32>
    %109 = tpu.matmul %105, %9, %cst_31 {dimension_numbers = #tpu.dot_dimension_numbers<[1], [0], [0], [1], [0, 0, 1, 1], [], []>} : vector<2x32xf32>, vector<32x96xf32>, vector<2x96xf32> -> vector<2x96xf32>
    %110 = arith.addf %109, %11 : vector<2x96xf32>
    %111 = vector.extract_strided_slice %108 {offsets = [0, 0], sizes = [2, 32], strides = [1, 1]} : vector<2x96xf32> to vector<2x32xf32>
    %112 = vector.extract_strided_slice %110 {offsets = [0, 0], sizes = [2, 32], strides = [1, 1]} : vector<2x96xf32> to vector<2x32xf32>
    %113 = arith.addf %111, %112 : vector<2x32xf32>
    %114 = arith.negf %113 : vector<2x32xf32>
    %115 = math.exp %114 : vector<2x32xf32>
    %cst_32 = arith.constant 1.000000e+00 : f32
    %116 = vector.broadcast %cst_32 : f32 to vector<2x32xf32>
    %117 = arith.addf %116, %115 : vector<2x32xf32>
    %118 = arith.divf %116, %117 : vector<2x32xf32>
    %119 = vector.extract_strided_slice %108 {offsets = [0, 32], sizes = [2, 32], strides = [1, 1]} : vector<2x96xf32> to vector<2x32xf32>
    %120 = vector.extract_strided_slice %110 {offsets = [0, 32], sizes = [2, 32], strides = [1, 1]} : vector<2x96xf32> to vector<2x32xf32>
    %121 = arith.addf %119, %120 : vector<2x32xf32>
    %122 = arith.negf %121 : vector<2x32xf32>
    %123 = math.exp %122 : vector<2x32xf32>
    %cst_33 = arith.constant 1.000000e+00 : f32
    %124 = vector.broadcast %cst_33 : f32 to vector<2x32xf32>
    %125 = arith.addf %124, %123 : vector<2x32xf32>
    %126 = arith.divf %124, %125 : vector<2x32xf32>
    %127 = vector.extract_strided_slice %108 {offsets = [0, 64], sizes = [2, 32], strides = [1, 1]} : vector<2x96xf32> to vector<2x32xf32>
    %128 = vector.extract_strided_slice %110 {offsets = [0, 64], sizes = [2, 32], strides = [1, 1]} : vector<2x96xf32> to vector<2x32xf32>
    %129 = arith.mulf %118, %128 : vector<2x32xf32>
    %130 = arith.addf %127, %129 : vector<2x32xf32>
    %131 = math.tanh %130 : vector<2x32xf32>
    %cst_34 = arith.constant 1.000000e+00 : f32
    %132 = vector.broadcast %cst_34 : f32 to vector<2x32xf32>
    %133 = arith.subf %132, %126 : vector<2x32xf32>
    %134 = arith.mulf %133, %131 : vector<2x32xf32>
    %135 = arith.mulf %126, %105 : vector<2x32xf32>
    %136 = arith.addf %134, %135 : vector<2x32xf32>
    %137 = vector.extract_strided_slice %7 {offsets = [8, 0], sizes = [2, 16], strides = [1, 1]} : vector<28x16xf32> to vector<2x16xf32>
    %cst_35 = arith.constant dense<0.000000e+00> : vector<2x96xf32>
    %138 = tpu.matmul %137, %8, %cst_35 {dimension_numbers = #tpu.dot_dimension_numbers<[1], [0], [0], [1], [0, 0, 1, 1], [], []>} : vector<2x16xf32>, vector<16x96xf32>, vector<2x96xf32> -> vector<2x96xf32>
    %139 = arith.addf %138, %10 : vector<2x96xf32>
    %cst_36 = arith.constant dense<0.000000e+00> : vector<2x96xf32>
    %140 = tpu.matmul %136, %9, %cst_36 {dimension_numbers = #tpu.dot_dimension_numbers<[1], [0], [0], [1], [0, 0, 1, 1], [], []>} : vector<2x32xf32>, vector<32x96xf32>, vector<2x96xf32> -> vector<2x96xf32>
    %141 = arith.addf %140, %11 : vector<2x96xf32>
    %142 = vector.extract_strided_slice %139 {offsets = [0, 0], sizes = [2, 32], strides = [1, 1]} : vector<2x96xf32> to vector<2x32xf32>
    %143 = vector.extract_strided_slice %141 {offsets = [0, 0], sizes = [2, 32], strides = [1, 1]} : vector<2x96xf32> to vector<2x32xf32>
    %144 = arith.addf %142, %143 : vector<2x32xf32>
    %145 = arith.negf %144 : vector<2x32xf32>
    %146 = math.exp %145 : vector<2x32xf32>
    %cst_37 = arith.constant 1.000000e+00 : f32
    %147 = vector.broadcast %cst_37 : f32 to vector<2x32xf32>
    %148 = arith.addf %147, %146 : vector<2x32xf32>
    %149 = arith.divf %147, %148 : vector<2x32xf32>
    %150 = vector.extract_strided_slice %139 {offsets = [0, 32], sizes = [2, 32], strides = [1, 1]} : vector<2x96xf32> to vector<2x32xf32>
    %151 = vector.extract_strided_slice %141 {offsets = [0, 32], sizes = [2, 32], strides = [1, 1]} : vector<2x96xf32> to vector<2x32xf32>
    %152 = arith.addf %150, %151 : vector<2x32xf32>
    %153 = arith.negf %152 : vector<2x32xf32>
    %154 = math.exp %153 : vector<2x32xf32>
    %cst_38 = arith.constant 1.000000e+00 : f32
    %155 = vector.broadcast %cst_38 : f32 to vector<2x32xf32>
    %156 = arith.addf %155, %154 : vector<2x32xf32>
    %157 = arith.divf %155, %156 : vector<2x32xf32>
    %158 = vector.extract_strided_slice %139 {offsets = [0, 64], sizes = [2, 32], strides = [1, 1]} : vector<2x96xf32> to vector<2x32xf32>
    %159 = vector.extract_strided_slice %141 {offsets = [0, 64], sizes = [2, 32], strides = [1, 1]} : vector<2x96xf32> to vector<2x32xf32>
    %160 = arith.mulf %149, %159 : vector<2x32xf32>
    %161 = arith.addf %158, %160 : vector<2x32xf32>
    %162 = math.tanh %161 : vector<2x32xf32>
    %cst_39 = arith.constant 1.000000e+00 : f32
    %163 = vector.broadcast %cst_39 : f32 to vector<2x32xf32>
    %164 = arith.subf %163, %157 : vector<2x32xf32>
    %165 = arith.mulf %164, %162 : vector<2x32xf32>
    %166 = arith.mulf %157, %136 : vector<2x32xf32>
    %167 = arith.addf %165, %166 : vector<2x32xf32>
    %168 = vector.extract_strided_slice %7 {offsets = [10, 0], sizes = [2, 16], strides = [1, 1]} : vector<28x16xf32> to vector<2x16xf32>
    %cst_40 = arith.constant dense<0.000000e+00> : vector<2x96xf32>
    %169 = tpu.matmul %168, %8, %cst_40 {dimension_numbers = #tpu.dot_dimension_numbers<[1], [0], [0], [1], [0, 0, 1, 1], [], []>} : vector<2x16xf32>, vector<16x96xf32>, vector<2x96xf32> -> vector<2x96xf32>
    %170 = arith.addf %169, %10 : vector<2x96xf32>
    %cst_41 = arith.constant dense<0.000000e+00> : vector<2x96xf32>
    %171 = tpu.matmul %167, %9, %cst_41 {dimension_numbers = #tpu.dot_dimension_numbers<[1], [0], [0], [1], [0, 0, 1, 1], [], []>} : vector<2x32xf32>, vector<32x96xf32>, vector<2x96xf32> -> vector<2x96xf32>
    %172 = arith.addf %171, %11 : vector<2x96xf32>
    %173 = vector.extract_strided_slice %170 {offsets = [0, 0], sizes = [2, 32], strides = [1, 1]} : vector<2x96xf32> to vector<2x32xf32>
    %174 = vector.extract_strided_slice %172 {offsets = [0, 0], sizes = [2, 32], strides = [1, 1]} : vector<2x96xf32> to vector<2x32xf32>
    %175 = arith.addf %173, %174 : vector<2x32xf32>
    %176 = arith.negf %175 : vector<2x32xf32>
    %177 = math.exp %176 : vector<2x32xf32>
    %cst_42 = arith.constant 1.000000e+00 : f32
    %178 = vector.broadcast %cst_42 : f32 to vector<2x32xf32>
    %179 = arith.addf %178, %177 : vector<2x32xf32>
    %180 = arith.divf %178, %179 : vector<2x32xf32>
    %181 = vector.extract_strided_slice %170 {offsets = [0, 32], sizes = [2, 32], strides = [1, 1]} : vector<2x96xf32> to vector<2x32xf32>
    %182 = vector.extract_strided_slice %172 {offsets = [0, 32], sizes = [2, 32], strides = [1, 1]} : vector<2x96xf32> to vector<2x32xf32>
    %183 = arith.addf %181, %182 : vector<2x32xf32>
    %184 = arith.negf %183 : vector<2x32xf32>
    %185 = math.exp %184 : vector<2x32xf32>
    %cst_43 = arith.constant 1.000000e+00 : f32
    %186 = vector.broadcast %cst_43 : f32 to vector<2x32xf32>
    %187 = arith.addf %186, %185 : vector<2x32xf32>
    %188 = arith.divf %186, %187 : vector<2x32xf32>
    %189 = vector.extract_strided_slice %170 {offsets = [0, 64], sizes = [2, 32], strides = [1, 1]} : vector<2x96xf32> to vector<2x32xf32>
    %190 = vector.extract_strided_slice %172 {offsets = [0, 64], sizes = [2, 32], strides = [1, 1]} : vector<2x96xf32> to vector<2x32xf32>
    %191 = arith.mulf %180, %190 : vector<2x32xf32>
    %192 = arith.addf %189, %191 : vector<2x32xf32>
    %193 = math.tanh %192 : vector<2x32xf32>
    %cst_44 = arith.constant 1.000000e+00 : f32
    %194 = vector.broadcast %cst_44 : f32 to vector<2x32xf32>
    %195 = arith.subf %194, %188 : vector<2x32xf32>
    %196 = arith.mulf %195, %193 : vector<2x32xf32>
    %197 = arith.mulf %188, %167 : vector<2x32xf32>
    %198 = arith.addf %196, %197 : vector<2x32xf32>
    %199 = vector.extract_strided_slice %7 {offsets = [12, 0], sizes = [2, 16], strides = [1, 1]} : vector<28x16xf32> to vector<2x16xf32>
    %cst_45 = arith.constant dense<0.000000e+00> : vector<2x96xf32>
    %200 = tpu.matmul %199, %8, %cst_45 {dimension_numbers = #tpu.dot_dimension_numbers<[1], [0], [0], [1], [0, 0, 1, 1], [], []>} : vector<2x16xf32>, vector<16x96xf32>, vector<2x96xf32> -> vector<2x96xf32>
    %201 = arith.addf %200, %10 : vector<2x96xf32>
    %cst_46 = arith.constant dense<0.000000e+00> : vector<2x96xf32>
    %202 = tpu.matmul %198, %9, %cst_46 {dimension_numbers = #tpu.dot_dimension_numbers<[1], [0], [0], [1], [0, 0, 1, 1], [], []>} : vector<2x32xf32>, vector<32x96xf32>, vector<2x96xf32> -> vector<2x96xf32>
    %203 = arith.addf %202, %11 : vector<2x96xf32>
    %204 = vector.extract_strided_slice %201 {offsets = [0, 0], sizes = [2, 32], strides = [1, 1]} : vector<2x96xf32> to vector<2x32xf32>
    %205 = vector.extract_strided_slice %203 {offsets = [0, 0], sizes = [2, 32], strides = [1, 1]} : vector<2x96xf32> to vector<2x32xf32>
    %206 = arith.addf %204, %205 : vector<2x32xf32>
    %207 = arith.negf %206 : vector<2x32xf32>
    %208 = math.exp %207 : vector<2x32xf32>
    %cst_47 = arith.constant 1.000000e+00 : f32
    %209 = vector.broadcast %cst_47 : f32 to vector<2x32xf32>
    %210 = arith.addf %209, %208 : vector<2x32xf32>
    %211 = arith.divf %209, %210 : vector<2x32xf32>
    %212 = vector.extract_strided_slice %201 {offsets = [0, 32], sizes = [2, 32], strides = [1, 1]} : vector<2x96xf32> to vector<2x32xf32>
    %213 = vector.extract_strided_slice %203 {offsets = [0, 32], sizes = [2, 32], strides = [1, 1]} : vector<2x96xf32> to vector<2x32xf32>
    %214 = arith.addf %212, %213 : vector<2x32xf32>
    %215 = arith.negf %214 : vector<2x32xf32>
    %216 = math.exp %215 : vector<2x32xf32>
    %cst_48 = arith.constant 1.000000e+00 : f32
    %217 = vector.broadcast %cst_48 : f32 to vector<2x32xf32>
    %218 = arith.addf %217, %216 : vector<2x32xf32>
    %219 = arith.divf %217, %218 : vector<2x32xf32>
    %220 = vector.extract_strided_slice %201 {offsets = [0, 64], sizes = [2, 32], strides = [1, 1]} : vector<2x96xf32> to vector<2x32xf32>
    %221 = vector.extract_strided_slice %203 {offsets = [0, 64], sizes = [2, 32], strides = [1, 1]} : vector<2x96xf32> to vector<2x32xf32>
    %222 = arith.mulf %211, %221 : vector<2x32xf32>
    %223 = arith.addf %220, %222 : vector<2x32xf32>
    %224 = math.tanh %223 : vector<2x32xf32>
    %cst_49 = arith.constant 1.000000e+00 : f32
    %225 = vector.broadcast %cst_49 : f32 to vector<2x32xf32>
    %226 = arith.subf %225, %219 : vector<2x32xf32>
    %227 = arith.mulf %226, %224 : vector<2x32xf32>
    %228 = arith.mulf %219, %198 : vector<2x32xf32>
    %229 = arith.addf %227, %228 : vector<2x32xf32>
    %230 = vector.extract_strided_slice %7 {offsets = [14, 0], sizes = [2, 16], strides = [1, 1]} : vector<28x16xf32> to vector<2x16xf32>
    %cst_50 = arith.constant dense<0.000000e+00> : vector<2x96xf32>
    %231 = tpu.matmul %230, %8, %cst_50 {dimension_numbers = #tpu.dot_dimension_numbers<[1], [0], [0], [1], [0, 0, 1, 1], [], []>} : vector<2x16xf32>, vector<16x96xf32>, vector<2x96xf32> -> vector<2x96xf32>
    %232 = arith.addf %231, %10 : vector<2x96xf32>
    %cst_51 = arith.constant dense<0.000000e+00> : vector<2x96xf32>
    %233 = tpu.matmul %229, %9, %cst_51 {dimension_numbers = #tpu.dot_dimension_numbers<[1], [0], [0], [1], [0, 0, 1, 1], [], []>} : vector<2x32xf32>, vector<32x96xf32>, vector<2x96xf32> -> vector<2x96xf32>
    %234 = arith.addf %233, %11 : vector<2x96xf32>
    %235 = vector.extract_strided_slice %232 {offsets = [0, 0], sizes = [2, 32], strides = [1, 1]} : vector<2x96xf32> to vector<2x32xf32>
    %236 = vector.extract_strided_slice %234 {offsets = [0, 0], sizes = [2, 32], strides = [1, 1]} : vector<2x96xf32> to vector<2x32xf32>
    %237 = arith.addf %235, %236 : vector<2x32xf32>
    %238 = arith.negf %237 : vector<2x32xf32>
    %239 = math.exp %238 : vector<2x32xf32>
    %cst_52 = arith.constant 1.000000e+00 : f32
    %240 = vector.broadcast %cst_52 : f32 to vector<2x32xf32>
    %241 = arith.addf %240, %239 : vector<2x32xf32>
    %242 = arith.divf %240, %241 : vector<2x32xf32>
    %243 = vector.extract_strided_slice %232 {offsets = [0, 32], sizes = [2, 32], strides = [1, 1]} : vector<2x96xf32> to vector<2x32xf32>
    %244 = vector.extract_strided_slice %234 {offsets = [0, 32], sizes = [2, 32], strides = [1, 1]} : vector<2x96xf32> to vector<2x32xf32>
    %245 = arith.addf %243, %244 : vector<2x32xf32>
    %246 = arith.negf %245 : vector<2x32xf32>
    %247 = math.exp %246 : vector<2x32xf32>
    %cst_53 = arith.constant 1.000000e+00 : f32
    %248 = vector.broadcast %cst_53 : f32 to vector<2x32xf32>
    %249 = arith.addf %248, %247 : vector<2x32xf32>
    %250 = arith.divf %248, %249 : vector<2x32xf32>
    %251 = vector.extract_strided_slice %232 {offsets = [0, 64], sizes = [2, 32], strides = [1, 1]} : vector<2x96xf32> to vector<2x32xf32>
    %252 = vector.extract_strided_slice %234 {offsets = [0, 64], sizes = [2, 32], strides = [1, 1]} : vector<2x96xf32> to vector<2x32xf32>
    %253 = arith.mulf %242, %252 : vector<2x32xf32>
    %254 = arith.addf %251, %253 : vector<2x32xf32>
    %255 = math.tanh %254 : vector<2x32xf32>
    %cst_54 = arith.constant 1.000000e+00 : f32
    %256 = vector.broadcast %cst_54 : f32 to vector<2x32xf32>
    %257 = arith.subf %256, %250 : vector<2x32xf32>
    %258 = arith.mulf %257, %255 : vector<2x32xf32>
    %259 = arith.mulf %250, %229 : vector<2x32xf32>
    %260 = arith.addf %258, %259 : vector<2x32xf32>
    %261 = vector.extract_strided_slice %7 {offsets = [16, 0], sizes = [2, 16], strides = [1, 1]} : vector<28x16xf32> to vector<2x16xf32>
    %cst_55 = arith.constant dense<0.000000e+00> : vector<2x96xf32>
    %262 = tpu.matmul %261, %8, %cst_55 {dimension_numbers = #tpu.dot_dimension_numbers<[1], [0], [0], [1], [0, 0, 1, 1], [], []>} : vector<2x16xf32>, vector<16x96xf32>, vector<2x96xf32> -> vector<2x96xf32>
    %263 = arith.addf %262, %10 : vector<2x96xf32>
    %cst_56 = arith.constant dense<0.000000e+00> : vector<2x96xf32>
    %264 = tpu.matmul %260, %9, %cst_56 {dimension_numbers = #tpu.dot_dimension_numbers<[1], [0], [0], [1], [0, 0, 1, 1], [], []>} : vector<2x32xf32>, vector<32x96xf32>, vector<2x96xf32> -> vector<2x96xf32>
    %265 = arith.addf %264, %11 : vector<2x96xf32>
    %266 = vector.extract_strided_slice %263 {offsets = [0, 0], sizes = [2, 32], strides = [1, 1]} : vector<2x96xf32> to vector<2x32xf32>
    %267 = vector.extract_strided_slice %265 {offsets = [0, 0], sizes = [2, 32], strides = [1, 1]} : vector<2x96xf32> to vector<2x32xf32>
    %268 = arith.addf %266, %267 : vector<2x32xf32>
    %269 = arith.negf %268 : vector<2x32xf32>
    %270 = math.exp %269 : vector<2x32xf32>
    %cst_57 = arith.constant 1.000000e+00 : f32
    %271 = vector.broadcast %cst_57 : f32 to vector<2x32xf32>
    %272 = arith.addf %271, %270 : vector<2x32xf32>
    %273 = arith.divf %271, %272 : vector<2x32xf32>
    %274 = vector.extract_strided_slice %263 {offsets = [0, 32], sizes = [2, 32], strides = [1, 1]} : vector<2x96xf32> to vector<2x32xf32>
    %275 = vector.extract_strided_slice %265 {offsets = [0, 32], sizes = [2, 32], strides = [1, 1]} : vector<2x96xf32> to vector<2x32xf32>
    %276 = arith.addf %274, %275 : vector<2x32xf32>
    %277 = arith.negf %276 : vector<2x32xf32>
    %278 = math.exp %277 : vector<2x32xf32>
    %cst_58 = arith.constant 1.000000e+00 : f32
    %279 = vector.broadcast %cst_58 : f32 to vector<2x32xf32>
    %280 = arith.addf %279, %278 : vector<2x32xf32>
    %281 = arith.divf %279, %280 : vector<2x32xf32>
    %282 = vector.extract_strided_slice %263 {offsets = [0, 64], sizes = [2, 32], strides = [1, 1]} : vector<2x96xf32> to vector<2x32xf32>
    %283 = vector.extract_strided_slice %265 {offsets = [0, 64], sizes = [2, 32], strides = [1, 1]} : vector<2x96xf32> to vector<2x32xf32>
    %284 = arith.mulf %273, %283 : vector<2x32xf32>
    %285 = arith.addf %282, %284 : vector<2x32xf32>
    %286 = math.tanh %285 : vector<2x32xf32>
    %cst_59 = arith.constant 1.000000e+00 : f32
    %287 = vector.broadcast %cst_59 : f32 to vector<2x32xf32>
    %288 = arith.subf %287, %281 : vector<2x32xf32>
    %289 = arith.mulf %288, %286 : vector<2x32xf32>
    %290 = arith.mulf %281, %260 : vector<2x32xf32>
    %291 = arith.addf %289, %290 : vector<2x32xf32>
    %292 = vector.extract_strided_slice %7 {offsets = [18, 0], sizes = [2, 16], strides = [1, 1]} : vector<28x16xf32> to vector<2x16xf32>
    %cst_60 = arith.constant dense<0.000000e+00> : vector<2x96xf32>
    %293 = tpu.matmul %292, %8, %cst_60 {dimension_numbers = #tpu.dot_dimension_numbers<[1], [0], [0], [1], [0, 0, 1, 1], [], []>} : vector<2x16xf32>, vector<16x96xf32>, vector<2x96xf32> -> vector<2x96xf32>
    %294 = arith.addf %293, %10 : vector<2x96xf32>
    %cst_61 = arith.constant dense<0.000000e+00> : vector<2x96xf32>
    %295 = tpu.matmul %291, %9, %cst_61 {dimension_numbers = #tpu.dot_dimension_numbers<[1], [0], [0], [1], [0, 0, 1, 1], [], []>} : vector<2x32xf32>, vector<32x96xf32>, vector<2x96xf32> -> vector<2x96xf32>
    %296 = arith.addf %295, %11 : vector<2x96xf32>
    %297 = vector.extract_strided_slice %294 {offsets = [0, 0], sizes = [2, 32], strides = [1, 1]} : vector<2x96xf32> to vector<2x32xf32>
    %298 = vector.extract_strided_slice %296 {offsets = [0, 0], sizes = [2, 32], strides = [1, 1]} : vector<2x96xf32> to vector<2x32xf32>
    %299 = arith.addf %297, %298 : vector<2x32xf32>
    %300 = arith.negf %299 : vector<2x32xf32>
    %301 = math.exp %300 : vector<2x32xf32>
    %cst_62 = arith.constant 1.000000e+00 : f32
    %302 = vector.broadcast %cst_62 : f32 to vector<2x32xf32>
    %303 = arith.addf %302, %301 : vector<2x32xf32>
    %304 = arith.divf %302, %303 : vector<2x32xf32>
    %305 = vector.extract_strided_slice %294 {offsets = [0, 32], sizes = [2, 32], strides = [1, 1]} : vector<2x96xf32> to vector<2x32xf32>
    %306 = vector.extract_strided_slice %296 {offsets = [0, 32], sizes = [2, 32], strides = [1, 1]} : vector<2x96xf32> to vector<2x32xf32>
    %307 = arith.addf %305, %306 : vector<2x32xf32>
    %308 = arith.negf %307 : vector<2x32xf32>
    %309 = math.exp %308 : vector<2x32xf32>
    %cst_63 = arith.constant 1.000000e+00 : f32
    %310 = vector.broadcast %cst_63 : f32 to vector<2x32xf32>
    %311 = arith.addf %310, %309 : vector<2x32xf32>
    %312 = arith.divf %310, %311 : vector<2x32xf32>
    %313 = vector.extract_strided_slice %294 {offsets = [0, 64], sizes = [2, 32], strides = [1, 1]} : vector<2x96xf32> to vector<2x32xf32>
    %314 = vector.extract_strided_slice %296 {offsets = [0, 64], sizes = [2, 32], strides = [1, 1]} : vector<2x96xf32> to vector<2x32xf32>
    %315 = arith.mulf %304, %314 : vector<2x32xf32>
    %316 = arith.addf %313, %315 : vector<2x32xf32>
    %317 = math.tanh %316 : vector<2x32xf32>
    %cst_64 = arith.constant 1.000000e+00 : f32
    %318 = vector.broadcast %cst_64 : f32 to vector<2x32xf32>
    %319 = arith.subf %318, %312 : vector<2x32xf32>
    %320 = arith.mulf %319, %317 : vector<2x32xf32>
    %321 = arith.mulf %312, %291 : vector<2x32xf32>
    %322 = arith.addf %320, %321 : vector<2x32xf32>
    %323 = vector.extract_strided_slice %7 {offsets = [20, 0], sizes = [2, 16], strides = [1, 1]} : vector<28x16xf32> to vector<2x16xf32>
    %cst_65 = arith.constant dense<0.000000e+00> : vector<2x96xf32>
    %324 = tpu.matmul %323, %8, %cst_65 {dimension_numbers = #tpu.dot_dimension_numbers<[1], [0], [0], [1], [0, 0, 1, 1], [], []>} : vector<2x16xf32>, vector<16x96xf32>, vector<2x96xf32> -> vector<2x96xf32>
    %325 = arith.addf %324, %10 : vector<2x96xf32>
    %cst_66 = arith.constant dense<0.000000e+00> : vector<2x96xf32>
    %326 = tpu.matmul %322, %9, %cst_66 {dimension_numbers = #tpu.dot_dimension_numbers<[1], [0], [0], [1], [0, 0, 1, 1], [], []>} : vector<2x32xf32>, vector<32x96xf32>, vector<2x96xf32> -> vector<2x96xf32>
    %327 = arith.addf %326, %11 : vector<2x96xf32>
    %328 = vector.extract_strided_slice %325 {offsets = [0, 0], sizes = [2, 32], strides = [1, 1]} : vector<2x96xf32> to vector<2x32xf32>
    %329 = vector.extract_strided_slice %327 {offsets = [0, 0], sizes = [2, 32], strides = [1, 1]} : vector<2x96xf32> to vector<2x32xf32>
    %330 = arith.addf %328, %329 : vector<2x32xf32>
    %331 = arith.negf %330 : vector<2x32xf32>
    %332 = math.exp %331 : vector<2x32xf32>
    %cst_67 = arith.constant 1.000000e+00 : f32
    %333 = vector.broadcast %cst_67 : f32 to vector<2x32xf32>
    %334 = arith.addf %333, %332 : vector<2x32xf32>
    %335 = arith.divf %333, %334 : vector<2x32xf32>
    %336 = vector.extract_strided_slice %325 {offsets = [0, 32], sizes = [2, 32], strides = [1, 1]} : vector<2x96xf32> to vector<2x32xf32>
    %337 = vector.extract_strided_slice %327 {offsets = [0, 32], sizes = [2, 32], strides = [1, 1]} : vector<2x96xf32> to vector<2x32xf32>
    %338 = arith.addf %336, %337 : vector<2x32xf32>
    %339 = arith.negf %338 : vector<2x32xf32>
    %340 = math.exp %339 : vector<2x32xf32>
    %cst_68 = arith.constant 1.000000e+00 : f32
    %341 = vector.broadcast %cst_68 : f32 to vector<2x32xf32>
    %342 = arith.addf %341, %340 : vector<2x32xf32>
    %343 = arith.divf %341, %342 : vector<2x32xf32>
    %344 = vector.extract_strided_slice %325 {offsets = [0, 64], sizes = [2, 32], strides = [1, 1]} : vector<2x96xf32> to vector<2x32xf32>
    %345 = vector.extract_strided_slice %327 {offsets = [0, 64], sizes = [2, 32], strides = [1, 1]} : vector<2x96xf32> to vector<2x32xf32>
    %346 = arith.mulf %335, %345 : vector<2x32xf32>
    %347 = arith.addf %344, %346 : vector<2x32xf32>
    %348 = math.tanh %347 : vector<2x32xf32>
    %cst_69 = arith.constant 1.000000e+00 : f32
    %349 = vector.broadcast %cst_69 : f32 to vector<2x32xf32>
    %350 = arith.subf %349, %343 : vector<2x32xf32>
    %351 = arith.mulf %350, %348 : vector<2x32xf32>
    %352 = arith.mulf %343, %322 : vector<2x32xf32>
    %353 = arith.addf %351, %352 : vector<2x32xf32>
    %354 = vector.extract_strided_slice %7 {offsets = [22, 0], sizes = [2, 16], strides = [1, 1]} : vector<28x16xf32> to vector<2x16xf32>
    %cst_70 = arith.constant dense<0.000000e+00> : vector<2x96xf32>
    %355 = tpu.matmul %354, %8, %cst_70 {dimension_numbers = #tpu.dot_dimension_numbers<[1], [0], [0], [1], [0, 0, 1, 1], [], []>} : vector<2x16xf32>, vector<16x96xf32>, vector<2x96xf32> -> vector<2x96xf32>
    %356 = arith.addf %355, %10 : vector<2x96xf32>
    %cst_71 = arith.constant dense<0.000000e+00> : vector<2x96xf32>
    %357 = tpu.matmul %353, %9, %cst_71 {dimension_numbers = #tpu.dot_dimension_numbers<[1], [0], [0], [1], [0, 0, 1, 1], [], []>} : vector<2x32xf32>, vector<32x96xf32>, vector<2x96xf32> -> vector<2x96xf32>
    %358 = arith.addf %357, %11 : vector<2x96xf32>
    %359 = vector.extract_strided_slice %356 {offsets = [0, 0], sizes = [2, 32], strides = [1, 1]} : vector<2x96xf32> to vector<2x32xf32>
    %360 = vector.extract_strided_slice %358 {offsets = [0, 0], sizes = [2, 32], strides = [1, 1]} : vector<2x96xf32> to vector<2x32xf32>
    %361 = arith.addf %359, %360 : vector<2x32xf32>
    %362 = arith.negf %361 : vector<2x32xf32>
    %363 = math.exp %362 : vector<2x32xf32>
    %cst_72 = arith.constant 1.000000e+00 : f32
    %364 = vector.broadcast %cst_72 : f32 to vector<2x32xf32>
    %365 = arith.addf %364, %363 : vector<2x32xf32>
    %366 = arith.divf %364, %365 : vector<2x32xf32>
    %367 = vector.extract_strided_slice %356 {offsets = [0, 32], sizes = [2, 32], strides = [1, 1]} : vector<2x96xf32> to vector<2x32xf32>
    %368 = vector.extract_strided_slice %358 {offsets = [0, 32], sizes = [2, 32], strides = [1, 1]} : vector<2x96xf32> to vector<2x32xf32>
    %369 = arith.addf %367, %368 : vector<2x32xf32>
    %370 = arith.negf %369 : vector<2x32xf32>
    %371 = math.exp %370 : vector<2x32xf32>
    %cst_73 = arith.constant 1.000000e+00 : f32
    %372 = vector.broadcast %cst_73 : f32 to vector<2x32xf32>
    %373 = arith.addf %372, %371 : vector<2x32xf32>
    %374 = arith.divf %372, %373 : vector<2x32xf32>
    %375 = vector.extract_strided_slice %356 {offsets = [0, 64], sizes = [2, 32], strides = [1, 1]} : vector<2x96xf32> to vector<2x32xf32>
    %376 = vector.extract_strided_slice %358 {offsets = [0, 64], sizes = [2, 32], strides = [1, 1]} : vector<2x96xf32> to vector<2x32xf32>
    %377 = arith.mulf %366, %376 : vector<2x32xf32>
    %378 = arith.addf %375, %377 : vector<2x32xf32>
    %379 = math.tanh %378 : vector<2x32xf32>
    %cst_74 = arith.constant 1.000000e+00 : f32
    %380 = vector.broadcast %cst_74 : f32 to vector<2x32xf32>
    %381 = arith.subf %380, %374 : vector<2x32xf32>
    %382 = arith.mulf %381, %379 : vector<2x32xf32>
    %383 = arith.mulf %374, %353 : vector<2x32xf32>
    %384 = arith.addf %382, %383 : vector<2x32xf32>
    %385 = vector.extract_strided_slice %7 {offsets = [24, 0], sizes = [2, 16], strides = [1, 1]} : vector<28x16xf32> to vector<2x16xf32>
    %cst_75 = arith.constant dense<0.000000e+00> : vector<2x96xf32>
    %386 = tpu.matmul %385, %8, %cst_75 {dimension_numbers = #tpu.dot_dimension_numbers<[1], [0], [0], [1], [0, 0, 1, 1], [], []>} : vector<2x16xf32>, vector<16x96xf32>, vector<2x96xf32> -> vector<2x96xf32>
    %387 = arith.addf %386, %10 : vector<2x96xf32>
    %cst_76 = arith.constant dense<0.000000e+00> : vector<2x96xf32>
    %388 = tpu.matmul %384, %9, %cst_76 {dimension_numbers = #tpu.dot_dimension_numbers<[1], [0], [0], [1], [0, 0, 1, 1], [], []>} : vector<2x32xf32>, vector<32x96xf32>, vector<2x96xf32> -> vector<2x96xf32>
    %389 = arith.addf %388, %11 : vector<2x96xf32>
    %390 = vector.extract_strided_slice %387 {offsets = [0, 0], sizes = [2, 32], strides = [1, 1]} : vector<2x96xf32> to vector<2x32xf32>
    %391 = vector.extract_strided_slice %389 {offsets = [0, 0], sizes = [2, 32], strides = [1, 1]} : vector<2x96xf32> to vector<2x32xf32>
    %392 = arith.addf %390, %391 : vector<2x32xf32>
    %393 = arith.negf %392 : vector<2x32xf32>
    %394 = math.exp %393 : vector<2x32xf32>
    %cst_77 = arith.constant 1.000000e+00 : f32
    %395 = vector.broadcast %cst_77 : f32 to vector<2x32xf32>
    %396 = arith.addf %395, %394 : vector<2x32xf32>
    %397 = arith.divf %395, %396 : vector<2x32xf32>
    %398 = vector.extract_strided_slice %387 {offsets = [0, 32], sizes = [2, 32], strides = [1, 1]} : vector<2x96xf32> to vector<2x32xf32>
    %399 = vector.extract_strided_slice %389 {offsets = [0, 32], sizes = [2, 32], strides = [1, 1]} : vector<2x96xf32> to vector<2x32xf32>
    %400 = arith.addf %398, %399 : vector<2x32xf32>
    %401 = arith.negf %400 : vector<2x32xf32>
    %402 = math.exp %401 : vector<2x32xf32>
    %cst_78 = arith.constant 1.000000e+00 : f32
    %403 = vector.broadcast %cst_78 : f32 to vector<2x32xf32>
    %404 = arith.addf %403, %402 : vector<2x32xf32>
    %405 = arith.divf %403, %404 : vector<2x32xf32>
    %406 = vector.extract_strided_slice %387 {offsets = [0, 64], sizes = [2, 32], strides = [1, 1]} : vector<2x96xf32> to vector<2x32xf32>
    %407 = vector.extract_strided_slice %389 {offsets = [0, 64], sizes = [2, 32], strides = [1, 1]} : vector<2x96xf32> to vector<2x32xf32>
    %408 = arith.mulf %397, %407 : vector<2x32xf32>
    %409 = arith.addf %406, %408 : vector<2x32xf32>
    %410 = math.tanh %409 : vector<2x32xf32>
    %cst_79 = arith.constant 1.000000e+00 : f32
    %411 = vector.broadcast %cst_79 : f32 to vector<2x32xf32>
    %412 = arith.subf %411, %405 : vector<2x32xf32>
    %413 = arith.mulf %412, %410 : vector<2x32xf32>
    %414 = arith.mulf %405, %384 : vector<2x32xf32>
    %415 = arith.addf %413, %414 : vector<2x32xf32>
    %416 = vector.extract_strided_slice %7 {offsets = [26, 0], sizes = [2, 16], strides = [1, 1]} : vector<28x16xf32> to vector<2x16xf32>
    %cst_80 = arith.constant dense<0.000000e+00> : vector<2x96xf32>
    %417 = tpu.matmul %416, %8, %cst_80 {dimension_numbers = #tpu.dot_dimension_numbers<[1], [0], [0], [1], [0, 0, 1, 1], [], []>} : vector<2x16xf32>, vector<16x96xf32>, vector<2x96xf32> -> vector<2x96xf32>
    %418 = arith.addf %417, %10 : vector<2x96xf32>
    %cst_81 = arith.constant dense<0.000000e+00> : vector<2x96xf32>
    %419 = tpu.matmul %415, %9, %cst_81 {dimension_numbers = #tpu.dot_dimension_numbers<[1], [0], [0], [1], [0, 0, 1, 1], [], []>} : vector<2x32xf32>, vector<32x96xf32>, vector<2x96xf32> -> vector<2x96xf32>
    %420 = arith.addf %419, %11 : vector<2x96xf32>
    %421 = vector.extract_strided_slice %418 {offsets = [0, 0], sizes = [2, 32], strides = [1, 1]} : vector<2x96xf32> to vector<2x32xf32>
    %422 = vector.extract_strided_slice %420 {offsets = [0, 0], sizes = [2, 32], strides = [1, 1]} : vector<2x96xf32> to vector<2x32xf32>
    %423 = arith.addf %421, %422 : vector<2x32xf32>
    %424 = arith.negf %423 : vector<2x32xf32>
    %425 = math.exp %424 : vector<2x32xf32>
    %cst_82 = arith.constant 1.000000e+00 : f32
    %426 = vector.broadcast %cst_82 : f32 to vector<2x32xf32>
    %427 = arith.addf %426, %425 : vector<2x32xf32>
    %428 = arith.divf %426, %427 : vector<2x32xf32>
    %429 = vector.extract_strided_slice %418 {offsets = [0, 32], sizes = [2, 32], strides = [1, 1]} : vector<2x96xf32> to vector<2x32xf32>
    %430 = vector.extract_strided_slice %420 {offsets = [0, 32], sizes = [2, 32], strides = [1, 1]} : vector<2x96xf32> to vector<2x32xf32>
    %431 = arith.addf %429, %430 : vector<2x32xf32>
    %432 = arith.negf %431 : vector<2x32xf32>
    %433 = math.exp %432 : vector<2x32xf32>
    %cst_83 = arith.constant 1.000000e+00 : f32
    %434 = vector.broadcast %cst_83 : f32 to vector<2x32xf32>
    %435 = arith.addf %434, %433 : vector<2x32xf32>
    %436 = arith.divf %434, %435 : vector<2x32xf32>
    %437 = vector.extract_strided_slice %418 {offsets = [0, 64], sizes = [2, 32], strides = [1, 1]} : vector<2x96xf32> to vector<2x32xf32>
    %438 = vector.extract_strided_slice %420 {offsets = [0, 64], sizes = [2, 32], strides = [1, 1]} : vector<2x96xf32> to vector<2x32xf32>
    %439 = arith.mulf %428, %438 : vector<2x32xf32>
    %440 = arith.addf %437, %439 : vector<2x32xf32>
    %441 = math.tanh %440 : vector<2x32xf32>
    %cst_84 = arith.constant 1.000000e+00 : f32
    %442 = vector.broadcast %cst_84 : f32 to vector<2x32xf32>
    %443 = arith.subf %442, %436 : vector<2x32xf32>
    %444 = arith.mulf %443, %441 : vector<2x32xf32>
    %445 = arith.mulf %436, %415 : vector<2x32xf32>
    %446 = arith.addf %444, %445 : vector<2x32xf32>
    %c0_85 = arith.constant 0 : index
    %c0_86 = arith.constant 0 : index
    %447 = vector.load %arg7[%c0_85, %c0_86] : memref<16x24xf32, #tpu.memory_space<vmem>>, vector<16x24xf32>
    %c0_87 = arith.constant 0 : index
    %c0_88 = arith.constant 0 : index
    %448 = vector.load %arg8[%c0_87, %c0_88] : memref<8x24xf32, #tpu.memory_space<vmem>>, vector<8x24xf32>
    %c0_89 = arith.constant 0 : index
    %c0_90 = arith.constant 0 : index
    %449 = vector.load %arg9[%c0_89, %c0_90] : memref<4x24xf32, #tpu.memory_space<vmem>>, vector<4x24xf32>
    %c0_91 = arith.constant 0 : index
    %c0_92 = arith.constant 0 : index
    %450 = vector.load %arg10[%c0_91, %c0_92] : memref<4x24xf32, #tpu.memory_space<vmem>>, vector<4x24xf32>
    %cst_93 = arith.constant 0.000000e+00 : f32
    %451 = vector.broadcast %cst_93 : f32 to vector<4x8xf32>
    %452 = vector.extract_strided_slice %7 {offsets = [4, 0], sizes = [4, 16], strides = [1, 1]} : vector<28x16xf32> to vector<4x16xf32>
    %cst_94 = arith.constant dense<0.000000e+00> : vector<4x24xf32>
    %453 = tpu.matmul %452, %447, %cst_94 {dimension_numbers = #tpu.dot_dimension_numbers<[1], [0], [0], [1], [0, 0, 1, 1], [], []>} : vector<4x16xf32>, vector<16x24xf32>, vector<4x24xf32> -> vector<4x24xf32>
    %454 = arith.addf %453, %449 : vector<4x24xf32>
    %cst_95 = arith.constant dense<0.000000e+00> : vector<4x24xf32>
    %455 = tpu.matmul %451, %448, %cst_95 {dimension_numbers = #tpu.dot_dimension_numbers<[1], [0], [0], [1], [0, 0, 1, 1], [], []>} : vector<4x8xf32>, vector<8x24xf32>, vector<4x24xf32> -> vector<4x24xf32>
    %456 = arith.addf %455, %450 : vector<4x24xf32>
    %457 = vector.extract_strided_slice %454 {offsets = [0, 0], sizes = [4, 8], strides = [1, 1]} : vector<4x24xf32> to vector<4x8xf32>
    %458 = vector.extract_strided_slice %456 {offsets = [0, 0], sizes = [4, 8], strides = [1, 1]} : vector<4x24xf32> to vector<4x8xf32>
    %459 = arith.addf %457, %458 : vector<4x8xf32>
    %460 = arith.negf %459 : vector<4x8xf32>
    %461 = math.exp %460 : vector<4x8xf32>
    %cst_96 = arith.constant 1.000000e+00 : f32
    %462 = vector.broadcast %cst_96 : f32 to vector<4x8xf32>
    %463 = arith.addf %462, %461 : vector<4x8xf32>
    %464 = arith.divf %462, %463 : vector<4x8xf32>
    %465 = vector.extract_strided_slice %454 {offsets = [0, 8], sizes = [4, 8], strides = [1, 1]} : vector<4x24xf32> to vector<4x8xf32>
    %466 = vector.extract_strided_slice %456 {offsets = [0, 8], sizes = [4, 8], strides = [1, 1]} : vector<4x24xf32> to vector<4x8xf32>
    %467 = arith.addf %465, %466 : vector<4x8xf32>
    %468 = arith.negf %467 : vector<4x8xf32>
    %469 = math.exp %468 : vector<4x8xf32>
    %cst_97 = arith.constant 1.000000e+00 : f32
    %470 = vector.broadcast %cst_97 : f32 to vector<4x8xf32>
    %471 = arith.addf %470, %469 : vector<4x8xf32>
    %472 = arith.divf %470, %471 : vector<4x8xf32>
    %473 = vector.extract_strided_slice %454 {offsets = [0, 16], sizes = [4, 8], strides = [1, 1]} : vector<4x24xf32> to vector<4x8xf32>
    %474 = vector.extract_strided_slice %456 {offsets = [0, 16], sizes = [4, 8], strides = [1, 1]} : vector<4x24xf32> to vector<4x8xf32>
    %475 = arith.mulf %464, %474 : vector<4x8xf32>
    %476 = arith.addf %473, %475 : vector<4x8xf32>
    %477 = math.tanh %476 : vector<4x8xf32>
    %cst_98 = arith.constant 1.000000e+00 : f32
    %478 = vector.broadcast %cst_98 : f32 to vector<4x8xf32>
    %479 = arith.subf %478, %472 : vector<4x8xf32>
    %480 = arith.mulf %479, %477 : vector<4x8xf32>
    %481 = arith.mulf %472, %451 : vector<4x8xf32>
    %482 = arith.addf %480, %481 : vector<4x8xf32>
    %483 = vector.extract_strided_slice %7 {offsets = [8, 0], sizes = [4, 16], strides = [1, 1]} : vector<28x16xf32> to vector<4x16xf32>
    %cst_99 = arith.constant dense<0.000000e+00> : vector<4x24xf32>
    %484 = tpu.matmul %483, %447, %cst_99 {dimension_numbers = #tpu.dot_dimension_numbers<[1], [0], [0], [1], [0, 0, 1, 1], [], []>} : vector<4x16xf32>, vector<16x24xf32>, vector<4x24xf32> -> vector<4x24xf32>
    %485 = arith.addf %484, %449 : vector<4x24xf32>
    %cst_100 = arith.constant dense<0.000000e+00> : vector<4x24xf32>
    %486 = tpu.matmul %482, %448, %cst_100 {dimension_numbers = #tpu.dot_dimension_numbers<[1], [0], [0], [1], [0, 0, 1, 1], [], []>} : vector<4x8xf32>, vector<8x24xf32>, vector<4x24xf32> -> vector<4x24xf32>
    %487 = arith.addf %486, %450 : vector<4x24xf32>
    %488 = vector.extract_strided_slice %485 {offsets = [0, 0], sizes = [4, 8], strides = [1, 1]} : vector<4x24xf32> to vector<4x8xf32>
    %489 = vector.extract_strided_slice %487 {offsets = [0, 0], sizes = [4, 8], strides = [1, 1]} : vector<4x24xf32> to vector<4x8xf32>
    %490 = arith.addf %488, %489 : vector<4x8xf32>
    %491 = arith.negf %490 : vector<4x8xf32>
    %492 = math.exp %491 : vector<4x8xf32>
    %cst_101 = arith.constant 1.000000e+00 : f32
    %493 = vector.broadcast %cst_101 : f32 to vector<4x8xf32>
    %494 = arith.addf %493, %492 : vector<4x8xf32>
    %495 = arith.divf %493, %494 : vector<4x8xf32>
    %496 = vector.extract_strided_slice %485 {offsets = [0, 8], sizes = [4, 8], strides = [1, 1]} : vector<4x24xf32> to vector<4x8xf32>
    %497 = vector.extract_strided_slice %487 {offsets = [0, 8], sizes = [4, 8], strides = [1, 1]} : vector<4x24xf32> to vector<4x8xf32>
    %498 = arith.addf %496, %497 : vector<4x8xf32>
    %499 = arith.negf %498 : vector<4x8xf32>
    %500 = math.exp %499 : vector<4x8xf32>
    %cst_102 = arith.constant 1.000000e+00 : f32
    %501 = vector.broadcast %cst_102 : f32 to vector<4x8xf32>
    %502 = arith.addf %501, %500 : vector<4x8xf32>
    %503 = arith.divf %501, %502 : vector<4x8xf32>
    %504 = vector.extract_strided_slice %485 {offsets = [0, 16], sizes = [4, 8], strides = [1, 1]} : vector<4x24xf32> to vector<4x8xf32>
    %505 = vector.extract_strided_slice %487 {offsets = [0, 16], sizes = [4, 8], strides = [1, 1]} : vector<4x24xf32> to vector<4x8xf32>
    %506 = arith.mulf %495, %505 : vector<4x8xf32>
    %507 = arith.addf %504, %506 : vector<4x8xf32>
    %508 = math.tanh %507 : vector<4x8xf32>
    %cst_103 = arith.constant 1.000000e+00 : f32
    %509 = vector.broadcast %cst_103 : f32 to vector<4x8xf32>
    %510 = arith.subf %509, %503 : vector<4x8xf32>
    %511 = arith.mulf %510, %508 : vector<4x8xf32>
    %512 = arith.mulf %503, %482 : vector<4x8xf32>
    %513 = arith.addf %511, %512 : vector<4x8xf32>
    %514 = vector.extract_strided_slice %7 {offsets = [12, 0], sizes = [4, 16], strides = [1, 1]} : vector<28x16xf32> to vector<4x16xf32>
    %cst_104 = arith.constant dense<0.000000e+00> : vector<4x24xf32>
    %515 = tpu.matmul %514, %447, %cst_104 {dimension_numbers = #tpu.dot_dimension_numbers<[1], [0], [0], [1], [0, 0, 1, 1], [], []>} : vector<4x16xf32>, vector<16x24xf32>, vector<4x24xf32> -> vector<4x24xf32>
    %516 = arith.addf %515, %449 : vector<4x24xf32>
    %cst_105 = arith.constant dense<0.000000e+00> : vector<4x24xf32>
    %517 = tpu.matmul %513, %448, %cst_105 {dimension_numbers = #tpu.dot_dimension_numbers<[1], [0], [0], [1], [0, 0, 1, 1], [], []>} : vector<4x8xf32>, vector<8x24xf32>, vector<4x24xf32> -> vector<4x24xf32>
    %518 = arith.addf %517, %450 : vector<4x24xf32>
    %519 = vector.extract_strided_slice %516 {offsets = [0, 0], sizes = [4, 8], strides = [1, 1]} : vector<4x24xf32> to vector<4x8xf32>
    %520 = vector.extract_strided_slice %518 {offsets = [0, 0], sizes = [4, 8], strides = [1, 1]} : vector<4x24xf32> to vector<4x8xf32>
    %521 = arith.addf %519, %520 : vector<4x8xf32>
    %522 = arith.negf %521 : vector<4x8xf32>
    %523 = math.exp %522 : vector<4x8xf32>
    %cst_106 = arith.constant 1.000000e+00 : f32
    %524 = vector.broadcast %cst_106 : f32 to vector<4x8xf32>
    %525 = arith.addf %524, %523 : vector<4x8xf32>
    %526 = arith.divf %524, %525 : vector<4x8xf32>
    %527 = vector.extract_strided_slice %516 {offsets = [0, 8], sizes = [4, 8], strides = [1, 1]} : vector<4x24xf32> to vector<4x8xf32>
    %528 = vector.extract_strided_slice %518 {offsets = [0, 8], sizes = [4, 8], strides = [1, 1]} : vector<4x24xf32> to vector<4x8xf32>
    %529 = arith.addf %527, %528 : vector<4x8xf32>
    %530 = arith.negf %529 : vector<4x8xf32>
    %531 = math.exp %530 : vector<4x8xf32>
    %cst_107 = arith.constant 1.000000e+00 : f32
    %532 = vector.broadcast %cst_107 : f32 to vector<4x8xf32>
    %533 = arith.addf %532, %531 : vector<4x8xf32>
    %534 = arith.divf %532, %533 : vector<4x8xf32>
    %535 = vector.extract_strided_slice %516 {offsets = [0, 16], sizes = [4, 8], strides = [1, 1]} : vector<4x24xf32> to vector<4x8xf32>
    %536 = vector.extract_strided_slice %518 {offsets = [0, 16], sizes = [4, 8], strides = [1, 1]} : vector<4x24xf32> to vector<4x8xf32>
    %537 = arith.mulf %526, %536 : vector<4x8xf32>
    %538 = arith.addf %535, %537 : vector<4x8xf32>
    %539 = math.tanh %538 : vector<4x8xf32>
    %cst_108 = arith.constant 1.000000e+00 : f32
    %540 = vector.broadcast %cst_108 : f32 to vector<4x8xf32>
    %541 = arith.subf %540, %534 : vector<4x8xf32>
    %542 = arith.mulf %541, %539 : vector<4x8xf32>
    %543 = arith.mulf %534, %513 : vector<4x8xf32>
    %544 = arith.addf %542, %543 : vector<4x8xf32>
    %545 = vector.extract_strided_slice %7 {offsets = [16, 0], sizes = [4, 16], strides = [1, 1]} : vector<28x16xf32> to vector<4x16xf32>
    %cst_109 = arith.constant dense<0.000000e+00> : vector<4x24xf32>
    %546 = tpu.matmul %545, %447, %cst_109 {dimension_numbers = #tpu.dot_dimension_numbers<[1], [0], [0], [1], [0, 0, 1, 1], [], []>} : vector<4x16xf32>, vector<16x24xf32>, vector<4x24xf32> -> vector<4x24xf32>
    %547 = arith.addf %546, %449 : vector<4x24xf32>
    %cst_110 = arith.constant dense<0.000000e+00> : vector<4x24xf32>
    %548 = tpu.matmul %544, %448, %cst_110 {dimension_numbers = #tpu.dot_dimension_numbers<[1], [0], [0], [1], [0, 0, 1, 1], [], []>} : vector<4x8xf32>, vector<8x24xf32>, vector<4x24xf32> -> vector<4x24xf32>
    %549 = arith.addf %548, %450 : vector<4x24xf32>
    %550 = vector.extract_strided_slice %547 {offsets = [0, 0], sizes = [4, 8], strides = [1, 1]} : vector<4x24xf32> to vector<4x8xf32>
    %551 = vector.extract_strided_slice %549 {offsets = [0, 0], sizes = [4, 8], strides = [1, 1]} : vector<4x24xf32> to vector<4x8xf32>
    %552 = arith.addf %550, %551 : vector<4x8xf32>
    %553 = arith.negf %552 : vector<4x8xf32>
    %554 = math.exp %553 : vector<4x8xf32>
    %cst_111 = arith.constant 1.000000e+00 : f32
    %555 = vector.broadcast %cst_111 : f32 to vector<4x8xf32>
    %556 = arith.addf %555, %554 : vector<4x8xf32>
    %557 = arith.divf %555, %556 : vector<4x8xf32>
    %558 = vector.extract_strided_slice %547 {offsets = [0, 8], sizes = [4, 8], strides = [1, 1]} : vector<4x24xf32> to vector<4x8xf32>
    %559 = vector.extract_strided_slice %549 {offsets = [0, 8], sizes = [4, 8], strides = [1, 1]} : vector<4x24xf32> to vector<4x8xf32>
    %560 = arith.addf %558, %559 : vector<4x8xf32>
    %561 = arith.negf %560 : vector<4x8xf32>
    %562 = math.exp %561 : vector<4x8xf32>
    %cst_112 = arith.constant 1.000000e+00 : f32
    %563 = vector.broadcast %cst_112 : f32 to vector<4x8xf32>
    %564 = arith.addf %563, %562 : vector<4x8xf32>
    %565 = arith.divf %563, %564 : vector<4x8xf32>
    %566 = vector.extract_strided_slice %547 {offsets = [0, 16], sizes = [4, 8], strides = [1, 1]} : vector<4x24xf32> to vector<4x8xf32>
    %567 = vector.extract_strided_slice %549 {offsets = [0, 16], sizes = [4, 8], strides = [1, 1]} : vector<4x24xf32> to vector<4x8xf32>
    %568 = arith.mulf %557, %567 : vector<4x8xf32>
    %569 = arith.addf %566, %568 : vector<4x8xf32>
    %570 = math.tanh %569 : vector<4x8xf32>
    %cst_113 = arith.constant 1.000000e+00 : f32
    %571 = vector.broadcast %cst_113 : f32 to vector<4x8xf32>
    %572 = arith.subf %571, %565 : vector<4x8xf32>
    %573 = arith.mulf %572, %570 : vector<4x8xf32>
    %574 = arith.mulf %565, %544 : vector<4x8xf32>
    %575 = arith.addf %573, %574 : vector<4x8xf32>
    %576 = vector.extract_strided_slice %7 {offsets = [20, 0], sizes = [4, 16], strides = [1, 1]} : vector<28x16xf32> to vector<4x16xf32>
    %cst_114 = arith.constant dense<0.000000e+00> : vector<4x24xf32>
    %577 = tpu.matmul %576, %447, %cst_114 {dimension_numbers = #tpu.dot_dimension_numbers<[1], [0], [0], [1], [0, 0, 1, 1], [], []>} : vector<4x16xf32>, vector<16x24xf32>, vector<4x24xf32> -> vector<4x24xf32>
    %578 = arith.addf %577, %449 : vector<4x24xf32>
    %cst_115 = arith.constant dense<0.000000e+00> : vector<4x24xf32>
    %579 = tpu.matmul %575, %448, %cst_115 {dimension_numbers = #tpu.dot_dimension_numbers<[1], [0], [0], [1], [0, 0, 1, 1], [], []>} : vector<4x8xf32>, vector<8x24xf32>, vector<4x24xf32> -> vector<4x24xf32>
    %580 = arith.addf %579, %450 : vector<4x24xf32>
    %581 = vector.extract_strided_slice %578 {offsets = [0, 0], sizes = [4, 8], strides = [1, 1]} : vector<4x24xf32> to vector<4x8xf32>
    %582 = vector.extract_strided_slice %580 {offsets = [0, 0], sizes = [4, 8], strides = [1, 1]} : vector<4x24xf32> to vector<4x8xf32>
    %583 = arith.addf %581, %582 : vector<4x8xf32>
    %584 = arith.negf %583 : vector<4x8xf32>
    %585 = math.exp %584 : vector<4x8xf32>
    %cst_116 = arith.constant 1.000000e+00 : f32
    %586 = vector.broadcast %cst_116 : f32 to vector<4x8xf32>
    %587 = arith.addf %586, %585 : vector<4x8xf32>
    %588 = arith.divf %586, %587 : vector<4x8xf32>
    %589 = vector.extract_strided_slice %578 {offsets = [0, 8], sizes = [4, 8], strides = [1, 1]} : vector<4x24xf32> to vector<4x8xf32>
    %590 = vector.extract_strided_slice %580 {offsets = [0, 8], sizes = [4, 8], strides = [1, 1]} : vector<4x24xf32> to vector<4x8xf32>
    %591 = arith.addf %589, %590 : vector<4x8xf32>
    %592 = arith.negf %591 : vector<4x8xf32>
    %593 = math.exp %592 : vector<4x8xf32>
    %cst_117 = arith.constant 1.000000e+00 : f32
    %594 = vector.broadcast %cst_117 : f32 to vector<4x8xf32>
    %595 = arith.addf %594, %593 : vector<4x8xf32>
    %596 = arith.divf %594, %595 : vector<4x8xf32>
    %597 = vector.extract_strided_slice %578 {offsets = [0, 16], sizes = [4, 8], strides = [1, 1]} : vector<4x24xf32> to vector<4x8xf32>
    %598 = vector.extract_strided_slice %580 {offsets = [0, 16], sizes = [4, 8], strides = [1, 1]} : vector<4x24xf32> to vector<4x8xf32>
    %599 = arith.mulf %588, %598 : vector<4x8xf32>
    %600 = arith.addf %597, %599 : vector<4x8xf32>
    %601 = math.tanh %600 : vector<4x8xf32>
    %cst_118 = arith.constant 1.000000e+00 : f32
    %602 = vector.broadcast %cst_118 : f32 to vector<4x8xf32>
    %603 = arith.subf %602, %596 : vector<4x8xf32>
    %604 = arith.mulf %603, %601 : vector<4x8xf32>
    %605 = arith.mulf %596, %575 : vector<4x8xf32>
    %606 = arith.addf %604, %605 : vector<4x8xf32>
    %607 = vector.extract_strided_slice %7 {offsets = [24, 0], sizes = [4, 16], strides = [1, 1]} : vector<28x16xf32> to vector<4x16xf32>
    %cst_119 = arith.constant dense<0.000000e+00> : vector<4x24xf32>
    %608 = tpu.matmul %607, %447, %cst_119 {dimension_numbers = #tpu.dot_dimension_numbers<[1], [0], [0], [1], [0, 0, 1, 1], [], []>} : vector<4x16xf32>, vector<16x24xf32>, vector<4x24xf32> -> vector<4x24xf32>
    %609 = arith.addf %608, %449 : vector<4x24xf32>
    %cst_120 = arith.constant dense<0.000000e+00> : vector<4x24xf32>
    %610 = tpu.matmul %606, %448, %cst_120 {dimension_numbers = #tpu.dot_dimension_numbers<[1], [0], [0], [1], [0, 0, 1, 1], [], []>} : vector<4x8xf32>, vector<8x24xf32>, vector<4x24xf32> -> vector<4x24xf32>
    %611 = arith.addf %610, %450 : vector<4x24xf32>
    %612 = vector.extract_strided_slice %609 {offsets = [0, 0], sizes = [4, 8], strides = [1, 1]} : vector<4x24xf32> to vector<4x8xf32>
    %613 = vector.extract_strided_slice %611 {offsets = [0, 0], sizes = [4, 8], strides = [1, 1]} : vector<4x24xf32> to vector<4x8xf32>
    %614 = arith.addf %612, %613 : vector<4x8xf32>
    %615 = arith.negf %614 : vector<4x8xf32>
    %616 = math.exp %615 : vector<4x8xf32>
    %cst_121 = arith.constant 1.000000e+00 : f32
    %617 = vector.broadcast %cst_121 : f32 to vector<4x8xf32>
    %618 = arith.addf %617, %616 : vector<4x8xf32>
    %619 = arith.divf %617, %618 : vector<4x8xf32>
    %620 = vector.extract_strided_slice %609 {offsets = [0, 8], sizes = [4, 8], strides = [1, 1]} : vector<4x24xf32> to vector<4x8xf32>
    %621 = vector.extract_strided_slice %611 {offsets = [0, 8], sizes = [4, 8], strides = [1, 1]} : vector<4x24xf32> to vector<4x8xf32>
    %622 = arith.addf %620, %621 : vector<4x8xf32>
    %623 = arith.negf %622 : vector<4x8xf32>
    %624 = math.exp %623 : vector<4x8xf32>
    %cst_122 = arith.constant 1.000000e+00 : f32
    %625 = vector.broadcast %cst_122 : f32 to vector<4x8xf32>
    %626 = arith.addf %625, %624 : vector<4x8xf32>
    %627 = arith.divf %625, %626 : vector<4x8xf32>
    %628 = vector.extract_strided_slice %609 {offsets = [0, 16], sizes = [4, 8], strides = [1, 1]} : vector<4x24xf32> to vector<4x8xf32>
    %629 = vector.extract_strided_slice %611 {offsets = [0, 16], sizes = [4, 8], strides = [1, 1]} : vector<4x24xf32> to vector<4x8xf32>
    %630 = arith.mulf %619, %629 : vector<4x8xf32>
    %631 = arith.addf %628, %630 : vector<4x8xf32>
    %632 = math.tanh %631 : vector<4x8xf32>
    %cst_123 = arith.constant 1.000000e+00 : f32
    %633 = vector.broadcast %cst_123 : f32 to vector<4x8xf32>
    %634 = arith.subf %633, %627 : vector<4x8xf32>
    %635 = arith.mulf %634, %632 : vector<4x8xf32>
    %636 = arith.mulf %627, %606 : vector<4x8xf32>
    %637 = arith.addf %635, %636 : vector<4x8xf32>
    %638 = vector.extract_strided_slice %637 {offsets = [0, 0], sizes = [2, 8], strides = [1, 1]} : vector<4x8xf32> to vector<2x8xf32>
    %639 = vector.extract_strided_slice %637 {offsets = [2, 0], sizes = [2, 8], strides = [1, 1]} : vector<4x8xf32> to vector<2x8xf32>
    %640 = tpu.concatenate %446, %638, %639 in 1 : vector<2x32xf32>, vector<2x8xf32>, vector<2x8xf32> -> vector<2x48xf32>
    %c0_124 = arith.constant 0 : index
    %c0_125 = arith.constant 0 : index
    %641 = vector.load %arg11[%c0_124, %c0_125] : memref<48x8xf32, #tpu.memory_space<vmem>>, vector<48x8xf32>
    %cst_126 = arith.constant dense<0.000000e+00> : vector<2x8xf32>
    %642 = tpu.matmul %640, %641, %cst_126 {dimension_numbers = #tpu.dot_dimension_numbers<[1], [0], [0], [1], [0, 0, 1, 1], [], []>} : vector<2x48xf32>, vector<48x8xf32>, vector<2x8xf32> -> vector<2x8xf32>
    %c0_127 = arith.constant 0 : index
    %c0_128 = arith.constant 0 : index
    %643 = vector.load %arg12[%c0_127, %c0_128] : memref<1x8xf32, #tpu.memory_space<vmem>>, vector<1x8xf32>
    %644 = vector.broadcast %643 : vector<1x8xf32> to vector<2x8xf32>
    %645 = arith.addf %642, %644 : vector<2x8xf32>
    %cst_129 = arith.constant 0.000000e+00 : f32
    %646 = vector.broadcast %cst_129 : f32 to vector<2x8xf32>
    %c0_130 = arith.constant 0 : index
    %c0_131 = arith.constant 0 : index
    %647 = memref.load %arg15[%c0_130, %c0_131] : memref<1x1xf32, #tpu.memory_space<smem>>
    %648 = vector.broadcast %647 : f32 to vector<2x8xf32>
    %649 = arith.addf %646, %648 : vector<2x8xf32>
    %c0_132 = arith.constant 0 : index
    %c0_133 = arith.constant 0 : index
    %c0_134 = arith.constant 0 : index
    %650 = vector.load %arg13[%c0_132, %c0_133, %c0_134] : memref<2x4x8xf32, #tpu.memory_space<vmem>>, vector<2x1x8xf32>
    %651 = vector.shape_cast %650 : vector<2x1x8xf32> to vector<2x8xf32>
    %c0_135 = arith.constant 0 : index
    %c0_136 = arith.constant 0 : index
    %652 = memref.load %arg14[%c0_135, %c0_136] : memref<1x4xf32, #tpu.memory_space<smem>>
    %653 = vector.broadcast %652 : f32 to vector<2x8xf32>
    %654 = arith.mulf %651, %653 : vector<2x8xf32>
    %655 = arith.addf %649, %654 : vector<2x8xf32>
    %c0_137 = arith.constant 0 : index
    %c1 = arith.constant 1 : index
    %c0_138 = arith.constant 0 : index
    %656 = vector.load %arg13[%c0_137, %c1, %c0_138] : memref<2x4x8xf32, #tpu.memory_space<vmem>>, vector<2x1x8xf32>
    %657 = vector.shape_cast %656 : vector<2x1x8xf32> to vector<2x8xf32>
    %c0_139 = arith.constant 0 : index
    %c1_140 = arith.constant 1 : index
    %658 = memref.load %arg14[%c0_139, %c1_140] : memref<1x4xf32, #tpu.memory_space<smem>>
    %659 = vector.broadcast %658 : f32 to vector<2x8xf32>
    %660 = arith.mulf %657, %659 : vector<2x8xf32>
    %661 = arith.addf %655, %660 : vector<2x8xf32>
    %c0_141 = arith.constant 0 : index
    %c2 = arith.constant 2 : index
    %c0_142 = arith.constant 0 : index
    %662 = vector.load %arg13[%c0_141, %c2, %c0_142] : memref<2x4x8xf32, #tpu.memory_space<vmem>>, vector<2x1x8xf32>
    %663 = vector.shape_cast %662 : vector<2x1x8xf32> to vector<2x8xf32>
    %c0_143 = arith.constant 0 : index
    %c2_144 = arith.constant 2 : index
    %664 = memref.load %arg14[%c0_143, %c2_144] : memref<1x4xf32, #tpu.memory_space<smem>>
    %665 = vector.broadcast %664 : f32 to vector<2x8xf32>
    %666 = arith.mulf %663, %665 : vector<2x8xf32>
    %667 = arith.addf %661, %666 : vector<2x8xf32>
    %c0_145 = arith.constant 0 : index
    %c3 = arith.constant 3 : index
    %c0_146 = arith.constant 0 : index
    %668 = vector.load %arg13[%c0_145, %c3, %c0_146] : memref<2x4x8xf32, #tpu.memory_space<vmem>>, vector<2x1x8xf32>
    %669 = vector.shape_cast %668 : vector<2x1x8xf32> to vector<2x8xf32>
    %c0_147 = arith.constant 0 : index
    %c3_148 = arith.constant 3 : index
    %670 = memref.load %arg14[%c0_147, %c3_148] : memref<1x4xf32, #tpu.memory_space<smem>>
    %671 = vector.broadcast %670 : f32 to vector<2x8xf32>
    %672 = arith.mulf %669, %671 : vector<2x8xf32>
    %673 = arith.addf %667, %672 : vector<2x8xf32>
    %674 = arith.addf %645, %673 : vector<2x8xf32>
    %c0_149 = arith.constant 0 : index
    %c0_150 = arith.constant 0 : index
    %c0_151 = arith.constant 0 : index
    %675 = vector.load %arg16[%c0_149, %c0_150, %c0_151] : memref<2x1x8xf32, #tpu.memory_space<vmem>>, vector<2x1x8xf32>
    %676 = vector.shape_cast %675 : vector<2x1x8xf32> to vector<2x8xf32>
    %677 = vector.shape_cast %674 : vector<2x8xf32> to vector<2x1x8xf32>
    tpu.vector_store %arg16[%c0_149, %c0_150, %c0_151], %677 {strides = array<i32>} : memref<2x1x8xf32, #tpu.memory_space<vmem>>, vector<2x1x8xf32>,
    return
  }
}

</mosaic_0001>

<bundles_post_ra>
// kernel: lstnet_forward.1
= control target key start
LH: loop header
LB: loop body
LE: loop exit
PB: predicated region body
PF: predicated region fallthrough
CT: control target
= control target key end

     0   :  { %s5425_s0 = inlined_call_operand.vmem [shape: f32[28,24], index: 0, kind: input, shape index: {}]   ;;  %s5426_s1 = inlined_call_operand.vmem [shape: f32[24,16], index: 1, kind: input, shape index: {}]   ;;  %s5427_s2 = inlined_call_operand.vmem [shape: f32[1,16], index: 2, kind: input, shape index: {}]   ;;  %s5428_s3 = inlined_call_operand.vmem [shape: f32[16,96], index: 3, kind: input, shape index: {}]   ;;  %s5429_s4 = inlined_call_operand.vmem [shape: f32[32,96], index: 4, kind: input, shape index: {}]   ;;  %s5430_s5 = inlined_call_operand.vmem [shape: f32[2,96], index: 5, kind: input, shape index: {}]   ;;  %s5431_s6 = inlined_call_operand.vmem [shape: f32[2,96], index: 6, kind: input, shape index: {}]   ;;  %s5432_s7 = inlined_call_operand.vmem [shape: f32[16,24], index: 7, kind: input, shape index: {}]   ;;  %s5433_s8 = inlined_call_operand.vmem [shape: f32[8,24], index: 8, kind: input, shape index: {}]   ;;  %s5434_s9 = inlined_call_operand.vmem [shape: f32[4,24], index: 9, kind: input, shape index: {}]   ;;  %s5435_s10 = inlined_call_operand.vmem [shape: f32[4,24], index: 10, kind: input, shape index: {}]   ;;  %s5436_s11 = inlined_call_operand.vmem [shape: f32[48,8], index: 11, kind: input, shape index: {}]   ;;  %s5437_s12 = inlined_call_operand.vmem [shape: f32[1,8], index: 12, kind: input, shape index: {}]   ;;  %s5438_s13 = inlined_call_operand.vmem [shape: f32[2,4,8], index: 13, kind: input, shape index: {}]   ;;  %s5439_s14 = inlined_call_operand.vmem [shape: f32[1,4], index: 14, kind: input, shape index: {}]   ;;  %s5440_s15 = inlined_call_operand.<no memory space> [shape: f32[1,1], index: 15, kind: input, shape index: {}]   ;;  %s5441_s16 = inlined_call_operand.hbm [shape: f32[2,1,8], index: 16, kind: output, shape index: {}]  }
   0x1   :  { %5443 = sst [smem:[#allocation9_spill]] %s5425_s0 }
   0x2   :  { %22 = vsyncpa [#allocation5], 0 }
   0x3   :  { %23 = vsyncpa [#allocation4], 0  ;;  %s58_s23 = sshll.u32 %s5439_s14, 4  ;;  %s59_s23 = int_to_ptr.vmem [resolvable:$true] %s58_s23 }
   0x4   :  { %s4562_s24 = scalar_lea.vmem %s59_s23, 16  ;;  %p4567_p1 = scmp.lt.s32.totalorder %s59_s23, %s59_s23 }
   0x5   :  { %p4563_p0 = scmp.ne.s32.totalorder %s59_s23, %s4562_s24  ;;  %p4568_p2 = scmp.lt.s32.totalorder %s4562_s24, %s4562_s24 }
   0x7   :  { %p4569_p3 = por %p4568_p2, %p4567_p1 }
   0x9   :  { %p4570_p4 = pnand %p4569_p3, %p4563_p0 }
   0xb   :  { %4573 = shalt.err (!%p4570_p4)
}
   0xc   :  { %s4598_s25 = smov [#allocation3]  }
   0xd   :  { %61 = dma.vmem_to_smem %s59_s23, 16, %s4598_s25, [#allocation5]  }
   0xe   :  { %4594 = dma.done.wait [#allocation5], 16  }
   0xf   :  { %4595 = vsyncadd [#allocation5], 4294967280 }
  0x10   :  { %67 = sfence }
  0x11   :  { %v74_v0 = vld [vmem:[%s5426_s1 + $0x10] sm:$0xff]  ;;  %v73_v1 = vld [vmem:[%s5426_s1 + $0x8] sm:$0xff]  ;;  %vm82_vm0 = vcmask 195584   ;;  %s5444_s0 = sld [smem:[#allocation9_spill]]  ;;  %v4599_v3 = vmov 0.0   ;;  %v72_v4 = vld [vmem:[%s5426_s1] sm:$0xff] }
  0x12   :  { %4070 = vmatprep.subr.mxu0 %v74_v0  ;;  %4082 = vmatprep.subr.mxu1 %v4599_v3  ;;  %vm4600_vm1 = vmmov 0   ;;  %v4721_v6 = vld [vmem:[%s5429_s4 + $0x18] sm:$0xff]  ;;  %v4731_v8 = vld [vmem:[%s5429_s4 + $0x10] sm:$0xff]  ;;  %v4742_v10 = vld [vmem:[%s5429_s4 + $0x8] sm:$0xff]  ;;  %vm192_vm2 = vcmask 130048   ;;  %s4602_s25 = smov 96  }
  0x13   :  { %4071 = vmatpush3.msra.mxu0 %v74_v0  ;;  %4086 = vmatprep.mubr.msk.f32.mxu1 %vm4600_vm1, %v4599_v3  ;;  %v4750_v11 = vld [vmem:[%s5429_s4] sm:$0xff]  ;;  %v4764_v12 = vld [vmem:[%s5428_s3 + $0x8] sm:$0xff]  ;;  %vm266_vm3 = vcmask 261120   ;;  %s4603_s28 = smov 112   ;;  %vm2703_vm4 = vcmask 64512   ;;  %vm3670_vm5 = vcmask 326656  }
  0x14   :  { %4072 = vmatprep.subr.mxu0 %v73_v1  ;;  %4083 = vmatpush3.msra.mxu1 %v4764_v12  ;;  %v4772_v13 = vld [vmem:[%s5428_s3] sm:$0xff]  ;;  %vm3685_vm6 = vcmask 392192   ;;  %s3912_s26 = sld [smem:[#allocation3 + $0x2]]  ;;  %vm3797_vm7 = vcmask 1041409   ;;  %vm3826_vm8 = vcmask 57344  }
  0x15   :  { %4073 = vmatpush3.msra.mxu0 %v73_v1  ;;  %4084 = vmatprep.subr.mxu1 %v4599_v3  ;;  %v3846_v14 = vld [vmem:[%s5427_s2] ss:$0 sm:$0xff]  ;;  %s4601_s2 = smov 64  }
  0x16   :  { %4074 = vmatprep.subr.mxu0 %v72_v4  ;;  %4085 = vmatpush3.msra.mxu1 %v4772_v13  ;;  %v4791_v23 = vld [vmem:[%s5431_s6] sm:$0x3] }
  0x17   :  { %v68_v2 = vld [vmem:[%s5444_s0] sm:$0xff]  ;;  %v69_v5 = vld [vmem:[%s5444_s0 + $0x8] sm:$0xff]  ;;  %v70_v7 = vld [vmem:[%s5444_s0 + $0x10] sm:$0xff]  ;;  %4075 = vmatpush3.msra.mxu0 %v72_v4  ;;  %4107 = vmatprep.subr.mxu1 %v4599_v3 }
  0x18   :  { %4076 = vmatprep.mubr.msk.f32.mxu0 %vm82_vm0, %v68_v2  ;;  %4089 = vmatprep.subr.mxu0 %v4599_v3  ;;  %v71_v9 = vld [vmem:[%s5444_s0 + $0x18] sm:$0xf]  ;;  %v4834_v30 = vld [vmem:[%s5430_s5] sm:$0x3] }
  0x19   :  { %4077 = vmatmul.mubr.msk.f32.vlgmr.msra.gmra.mxu0 %vm82_vm0, %v69_v5 }
  0x1a   :  { %4090 = vmatpush3.msra.mxu0 %v4721_v6  ;;  %4079 = vmatprep.mubr.msk.f32.mxu0 %vm82_vm0, %v70_v7 }
  0x1b   :  { %4091 = vmatprep.subr.mxu0 %v4599_v3 }
  0x1c   :  { %4092 = vmatpush3.msra.mxu0 %v4731_v8 }
  0x1d   :  { %4080 = vmatmul.mubr.msk.f32.gmra.mxu0 %vm82_vm0, %v71_v9  ;;  %4093 = vmatprep.subr.mxu0 %v4599_v3 }
  0x1e   :  { %4094 = vmatpush3.msra.mxu0 %v4742_v10  ;;  %4097 = vmatprep.mubr.msk.f32.mxu0 %vm4600_vm1, %v4599_v3 }
  0x1f   :  { %4095 = vmatprep.subr.mxu0 %v4599_v3 }
  0x20   :  { %4096 = vmatpush3.msra.mxu0 %v4750_v11 }
  0x21   :  { %4098 = vmatmul.mubr.f32.vlgmr.msra.gmra.mxu0 %v4599_v3  ;;  %4100 = vmatprep.subr.mxu0 %v4599_v3 }
  0x22   :  { %4104 = vmatprep.mubr.msk.f32.mxu0 %vm4600_vm1, %v4599_v3  ;;  %4101 = vmatpush3.msra.mxu0 %v4764_v12 }
  0x23   :  { %4102 = vmatprep.subr.mxu0 %v4599_v3 }
  0x24   :  { %4103 = vmatpush3.msra.mxu0 %v4772_v13 }
  0x25   :  { %4118 = vmatprep.subr.mxu0 %v4599_v3 }
  0xd9   :  { %v4078_v15 = vpop.f32.mrf.mxu0 }
  0xda   :  { %v4782_v16 = vadd.f32 %v4078_v15, %v3846_v14 }
  0xdb   :  { %v161_v17 = vpop.f32.mrf.mxu0 }
  0xdc   :  { %v162_v18 = vadd.f32 %v3846_v14, %v161_v17 }
  0xdd   :  { %v4081_v19 = vpop.f32.mrf.mxu0 }
  0xde   :  { %v4784_v20 = vmax.f32 %v162_v18, 0.0  ;;  %v4786_v21 = vadd.f32 %v4081_v19, %v3846_v14 }
  0xdf   :  { %v171_v22 = vpop.f32.mrf.mxu0 }
  0xe0   :  { %v366_v24 = vrot.slane %v4784_v20, 2  ;;  %4087 = vmatmul.mubr.msk.f32.vlgmr.msra.gmra.mxu1 %vm192_vm2, %v4784_v20  ;;  %v4796_v25 = vadd.f32 %v3846_v14, %v171_v22  ;;  %v540_v29 = vrot.slane %v4784_v20, 4  ;;  %v714_v54 = vrot.slane %v4784_v20, 6 }
  0xe1   :  { %v336_v26 = vpop.f32.mrf.mxu0  ;;  %4108 = vmatpush3.msra.mxu1 %v4721_v6  ;;  %4115 = vmatprep.mubr.msk.f32.mxu1 %vm4600_vm1, %v4599_v3 }
  0xe2   :  { %4105 = vmatmul.mubr.msk.f32.vlgmr.msra.gmra.mxu0 %vm192_vm2, %v366_v24  ;;  %v337_v27 = vadd.f32 %v336_v26, %v4791_v23  ;;  %4109 = vmatprep.subr.mxu1 %v4599_v3  ;;  %v4874_v24 = vmax.f32 %v4782_v16, 0.0 }
  0xe3   :  { %4119 = vmatpush3.msra.mxu0 %v4764_v12  ;;  %4122 = vmatprep.mubr.msk.f32.mxu0 %vm4600_vm1, %v4599_v3  ;;  %v4099_v28 = vpop.f32.mrf.mxu0 }
  0xe4   :  { %4120 = vmatprep.subr.mxu0 %v4599_v3  ;;  %348 = vrot.lane.b32.xlu0 %v337_v27, %s4601_s2 }
  0xe5   :  { %4121 = vmatpush3.msra.mxu0 %v4772_v13  ;;  %4110 = vmatpush3.msra.mxu1 %v4731_v8 }
  0xe6   :  { %4123 = vmatmul.mubr.msk.f32.vlgmr.msra.gmra.mxu0 %vm192_vm2, %v540_v29  ;;  %4111 = vmatprep.subr.mxu1 %v4599_v3 }
  0xe7   :  { %4112 = vmatpush3.msra.mxu1 %v4742_v10  ;;  %4125 = vmatprep.subr.mxu0 %v4599_v3 }
  0xe8   :  { %4113 = vmatprep.subr.mxu1 %v4599_v3  ;;  %4126 = vmatpush3.msra.mxu0 %v4721_v6 }
  0xe9   :  { %4114 = vmatpush3.msra.mxu1 %v4750_v11  ;;  %4127 = vmatprep.subr.mxu0 %v4599_v3 }
  0xea   :  { %4136 = vmatprep.subr.mxu1 %v4599_v3  ;;  %4128 = vmatpush3.msra.mxu0 %v4731_v8 }
  0xeb   :  { %4129 = vmatprep.subr.mxu0 %v4599_v3  ;;  %4133 = vmatprep.mubr.msk.f32.mxu0 %vm4600_vm1, %v4599_v3 }
  0xec   :  { %4130 = vmatpush3.msra.mxu0 %v4742_v10 }
  0xed   :  { %4131 = vmatprep.subr.mxu0 %v4599_v3 }
  0xee   :  { %4132 = vmatpush3.msra.mxu0 %v4750_v11 }
  0xef   :  { %4154 = vmatprep.subr.mxu0 %v4599_v3 }
 0x156   :  { %v349_v42 = vpop.permute.xlu0 %348 }
 0x1a0   :  { %v262_v31 = vpop.f32.mrf.mxu1 }
 0x1a1   :  { %v263_v32 = vadd.f32 %v262_v31, %v4834_v30 }
 0x1a2   :  { %v4088_v33 = vpop.f32.mrf.mxu1  ;;  %v435_v34 = vpop.f32.mrf.mxu0 }
 0x1a3   :  { %v340_v35 = vadd.f32 %v337_v27, %v263_v32  ;;  %v436_v60 = vadd.f32 %v435_v34, %v4834_v30 }
 0x1a4   :  { %v4106_v36 = vpop.f32.mrf.mxu0 }
 0x1a5   :  { %v3852_v37 = vmul.f32 -1.442695, %v340_v35 }
 0x1a6   :  { %v4837_v38 = vpop.f32.mrf.mxu0 }
 0x1a7   :  { %4434 = vpow2.f32 %v3852_v37 }
 0x1a8   :  { %v4124_v39 = vpop.f32.mrf.mxu0 }
 0x1b4   :  { %v4435_v40 = vpop.eup %4434 }
 0x1b5   :  { %v344_v41 = vadd.f32 1.0, %v4435_v40 }
 0x1b7   :  { %4436 = vrcp.f32 %v344_v41 }
 0x1c4   :  { %v4437_v43 = vpop.eup %4436 }
 0x1c5   :  { %v351_v44 = vmul.f32 %v4437_v43, %v349_v42  ;;  %v358_v48 = vsub.f32 1.0, %v4437_v43  ;;  %v364_v50 = vmul.f32 0.0, %v4437_v43 }
 0x1c7   :  { %353 = vrot.lane.b32.xlu0 %v351_v44, %s4601_s2 }
 0x239   :  { %v354_v45 = vpop.permute.xlu0 %353 }
 0x23a   :  { %v356_v46 = vadd.f32 %v354_v45, %v263_v32  ;;  %v610_v32 = vadd.f32 %v4837_v38, %v4834_v30 }
 0x23c   :  { %4438 = vtanh.f32 %v356_v46 }
 0x249   :  { %v4439_v47 = vpop.eup %4438 }
 0x24a   :  { %360 = vrot.lane.b32.xlu1 %v4439_v47, %s4602_s25 }
 0x2bc   :  { %v361_v49 = vpop.permute.xlu1 %360 }
 0x2bd   :  { %v363_v51 = vmul.f32 %v361_v49, %v358_v48  ;;  %v1062_v49 = vrot.slane %v4874_v24, 2 }
 0x2bf   :  { %v365_v52 = vadd.f32 %v364_v50, %v363_v51 }
 0x2c1   :  { %440 = vrot.lane.b32.xlu1 %v365_v52, %s4602_s25 }
 0x333   :  { %v441_v53 = vpop.permute.xlu1 %440 }
 0x334   :  { %4116 = vmatmul.mubr.msk.f32.vlgmr.msra.gmra.mxu1 %vm266_vm3, %v441_v53 }
 0x335   :  { %4137 = vmatpush3.msra.mxu1 %v4764_v12  ;;  %4140 = vmatprep.mubr.msk.f32.mxu1 %vm4600_vm1, %v4599_v3 }
 0x336   :  { %4138 = vmatprep.subr.mxu1 %v4599_v3 }
 0x337   :  { %4139 = vmatpush3.msra.mxu1 %v4772_v13 }
 0x338   :  { %4141 = vmatmul.mubr.msk.f32.vlgmr.msra.gmra.mxu1 %vm192_vm2, %v714_v54  ;;  %4143 = vmatprep.subr.mxu1 %v4599_v3 }
 0x339   :  { %4144 = vmatpush3.msra.mxu1 %v4721_v6  ;;  %4151 = vmatprep.mubr.msk.f32.mxu1 %vm4600_vm1, %v4599_v3 }
 0x33a   :  { %4145 = vmatprep.subr.mxu1 %v4599_v3 }
 0x33b   :  { %4146 = vmatpush3.msra.mxu1 %v4731_v8 }
 0x33c   :  { %4147 = vmatprep.subr.mxu1 %v4599_v3 }
 0x33d   :  { %4148 = vmatpush3.msra.mxu1 %v4742_v10 }
 0x33e   :  { %4149 = vmatprep.subr.mxu1 %v4599_v3 }
 0x33f   :  { %4150 = vmatpush3.msra.mxu1 %v4750_v11 }
 0x340   :  { %4172 = vmatprep.subr.mxu1 %v4599_v3 }
 0x3f4   :  { %v510_v55 = vpop.f32.mrf.mxu1 }
 0x3f5   :  { %v511_v56 = vadd.f32 %v510_v55, %v4791_v23 }
 0x3f6   :  { %v4117_v57 = vpop.f32.mrf.mxu1 }
 0x3f7   :  { %522 = vrot.lane.b32.xlu0 %v511_v56, %s4601_s2  ;;  %v514_v61 = vadd.f32 %v511_v56, %v436_v60 }
 0x3f8   :  { %v4863_v58 = vpop.f32.mrf.mxu1 }
 0x3f9   :  { %v3855_v62 = vmul.f32 -1.442695, %v514_v61  ;;  %v784_v55 = vadd.f32 %v4863_v58, %v4834_v30 }
 0x3fa   :  { %v4142_v59 = vpop.f32.mrf.mxu1 }
 0x3fb   :  { %4440 = vpow2.f32 %v3855_v62 }
 0x408   :  { %v4441_v63 = vpop.eup %4440 }
 0x409   :  { %v518_v0 = vadd.f32 1.0, %v4441_v63 }
 0x40b   :  { %4442 = vrcp.f32 %v518_v0 }
 0x418   :  { %v4443_v1 = vpop.eup %4442 }
 0x419   :  { %v532_v14 = vsub.f32 1.0, %v4443_v1  ;;  %v538_v17 = vmul.f32 %v4443_v1, %v365_v52 }
 0x469   :  { %v523_v2 = vpop.permute.xlu0 %522 }
 0x46a   :  { %v525_v4 = vmul.f32 %v4443_v1, %v523_v2 }
 0x46c   :  { %527 = vrot.lane.b32.xlu1 %v525_v4, %s4601_s2 }
 0x4de   :  { %v528_v5 = vpop.permute.xlu1 %527 }
 0x4df   :  { %v530_v7 = vadd.f32 %v528_v5, %v436_v60 }
 0x4e1   :  { %4444 = vtanh.f32 %v530_v7 }
 0x4ee   :  { %v4445_v9 = vpop.eup %4444 }
 0x4ef   :  { %534 = vrot.lane.b32.xlu0 %v4445_v9, %s4602_s25 }
 0x561   :  { %v535_v15 = vpop.permute.xlu0 %534 }
 0x562   :  { %v537_v18 = vmul.f32 %v535_v15, %v532_v14  ;;  %v1236_v15 = vrot.slane %v4874_v24, 4 }
 0x564   :  { %v539_v19 = vadd.f32 %v538_v17, %v537_v18 }
 0x566   :  { %614 = vrot.lane.b32.xlu1 %v539_v19, %s4602_s25 }
 0x5d8   :  { %v615_v22 = vpop.permute.xlu1 %614 }
 0x5d9   :  { %4134 = vmatmul.mubr.msk.f32.vlgmr.msra.gmra.mxu0 %vm266_vm3, %v615_v22 }
 0x5da   :  { %4155 = vmatpush3.msra.mxu0 %v4764_v12  ;;  %4158 = vmatprep.mubr.msk.f32.mxu0 %vm4600_vm1, %v4599_v3 }
 0x5db   :  { %4156 = vmatprep.subr.mxu0 %v4599_v3 }
 0x5dc   :  { %4157 = vmatpush3.msra.mxu0 %v4772_v13 }
 0x5dd   :  { %4159 = vmatmul.mubr.msk.f32.vlgmr.msra.gmra.mxu0 %vm192_vm2, %v4874_v24  ;;  %4161 = vmatprep.subr.mxu0 %v4599_v3 }
 0x5de   :  { %4162 = vmatpush3.msra.mxu0 %v4721_v6  ;;  %4169 = vmatprep.mubr.msk.f32.mxu0 %vm4600_vm1, %v4599_v3 }
 0x5df   :  { %4163 = vmatprep.subr.mxu0 %v4599_v3 }
 0x5e0   :  { %4164 = vmatpush3.msra.mxu0 %v4731_v8 }
 0x5e1   :  { %4165 = vmatprep.subr.mxu0 %v4599_v3 }
 0x5e2   :  { %4166 = vmatpush3.msra.mxu0 %v4742_v10 }
 0x5e3   :  { %4167 = vmatprep.subr.mxu0 %v4599_v3 }
 0x5e4   :  { %4168 = vmatpush3.msra.mxu0 %v4750_v11 }
 0x5e5   :  { %4190 = vmatprep.subr.mxu0 %v4599_v3 }
 0x699   :  { %v684_v16 = vpop.f32.mrf.mxu0 }
 0x69a   :  { %v685_v26 = vadd.f32 %v684_v16, %v4791_v23 }
 0x69b   :  { %v4135_v27 = vpop.f32.mrf.mxu0 }
 0x69c   :  { %696 = vrot.lane.b32.xlu0 %v685_v26, %s4601_s2  ;;  %v688_v33 = vadd.f32 %v685_v26, %v610_v32 }
 0x69d   :  { %v4893_v28 = vpop.f32.mrf.mxu0 }
 0x69e   :  { %v3858_v34 = vmul.f32 -1.442695, %v688_v33  ;;  %v958_v26 = vadd.f32 %v4893_v28, %v4834_v30 }
 0x69f   :  { %v4160_v31 = vpop.f32.mrf.mxu0 }
 0x6a0   :  { %4446 = vpow2.f32 %v3858_v34 }
 0x6ad   :  { %v4447_v35 = vpop.eup %4446 }
 0x6ae   :  { %v692_v36 = vadd.f32 1.0, %v4447_v35 }
 0x6b0   :  { %4448 = vrcp.f32 %v692_v36 }
 0x6bd   :  { %v4449_v37 = vpop.eup %4448 }
 0x6be   :  { %v706_v44 = vsub.f32 1.0, %v4449_v37  ;;  %v712_v38 = vmul.f32 %v4449_v37, %v539_v19 }
 0x70e   :  { %v697_v39 = vpop.permute.xlu0 %696 }
 0x70f   :  { %v699_v40 = vmul.f32 %v4449_v37, %v697_v39 }
 0x711   :  { %701 = vrot.lane.b32.xlu1 %v699_v40, %s4601_s2 }
 0x783   :  { %v702_v41 = vpop.permute.xlu1 %701 }
 0x784   :  { %v704_v42 = vadd.f32 %v702_v41, %v610_v32 }
 0x786   :  { %4450 = vtanh.f32 %v704_v42 }
 0x793   :  { %v4451_v43 = vpop.eup %4450 }
 0x794   :  { %708 = vrot.lane.b32.xlu0 %v4451_v43, %s4602_s25 }
 0x806   :  { %v709_v45 = vpop.permute.xlu0 %708 }
 0x807   :  { %v711_v46 = vmul.f32 %v709_v45, %v706_v44 }
 0x809   :  { %v713_v47 = vadd.f32 %v712_v38, %v711_v46  ;;  %v1410_v38 = vrot.slane %v4874_v24, 6 }
 0x80b   :  { %788 = vrot.lane.b32.xlu1 %v713_v47, %s4602_s25 }
 0x87d   :  { %v789_v48 = vpop.permute.xlu1 %788 }
 0x87e   :  { %4152 = vmatmul.mubr.msk.f32.vlgmr.msra.gmra.mxu1 %vm266_vm3, %v789_v48 }
 0x87f   :  { %4173 = vmatpush3.msra.mxu1 %v4764_v12  ;;  %4176 = vmatprep.mubr.msk.f32.mxu1 %vm4600_vm1, %v4599_v3 }
 0x880   :  { %4174 = vmatprep.subr.mxu1 %v4599_v3 }
 0x881   :  { %4175 = vmatpush3.msra.mxu1 %v4772_v13 }
 0x882   :  { %4177 = vmatmul.mubr.msk.f32.vlgmr.msra.gmra.mxu1 %vm192_vm2, %v1062_v49  ;;  %4179 = vmatprep.subr.mxu1 %v4599_v3 }
 0x883   :  { %4180 = vmatpush3.msra.mxu1 %v4721_v6  ;;  %4187 = vmatprep.mubr.msk.f32.mxu1 %vm4600_vm1, %v4599_v3 }
 0x884   :  { %4181 = vmatprep.subr.mxu1 %v4599_v3 }
 0x885   :  { %4182 = vmatpush3.msra.mxu1 %v4731_v8 }
 0x886   :  { %4183 = vmatprep.subr.mxu1 %v4599_v3 }
 0x887   :  { %4184 = vmatpush3.msra.mxu1 %v4742_v10 }
 0x888   :  { %4185 = vmatprep.subr.mxu1 %v4599_v3 }
 0x889   :  { %4186 = vmatpush3.msra.mxu1 %v4750_v11 }
 0x88a   :  { %4208 = vmatprep.subr.mxu1 %v4599_v3 }
 0x93e   :  { %v858_v50 = vpop.f32.mrf.mxu1 }
 0x93f   :  { %v859_v51 = vadd.f32 %v858_v50, %v4791_v23 }
 0x940   :  { %v4153_v52 = vpop.f32.mrf.mxu1 }
 0x941   :  { %870 = vrot.lane.b32.xlu0 %v859_v51, %s4601_s2  ;;  %v862_v56 = vadd.f32 %v859_v51, %v784_v55 }
 0x942   :  { %v4921_v53 = vpop.f32.mrf.mxu1 }
 0x943   :  { %v3861_v57 = vmul.f32 -1.442695, %v862_v56  ;;  %v1132_v51 = vadd.f32 %v4921_v53, %v4834_v30 }
 0x944   :  { %v4178_v54 = vpop.f32.mrf.mxu1 }
 0x945   :  { %4452 = vpow2.f32 %v3861_v57 }
 0x952   :  { %v4453_v59 = vpop.eup %4452 }
 0x953   :  { %v866_v60 = vadd.f32 1.0, %v4453_v59 }
 0x955   :  { %4454 = vrcp.f32 %v866_v60 }
 0x962   :  { %v4455_v61 = vpop.eup %4454 }
 0x963   :  { %v880_v4 = vsub.f32 1.0, %v4455_v61  ;;  %v886_v58 = vmul.f32 %v4455_v61, %v713_v47 }
 0x9b3   :  { %v871_v62 = vpop.permute.xlu0 %870 }
 0x9b4   :  { %v873_v63 = vmul.f32 %v4455_v61, %v871_v62 }
 0x9b6   :  { %875 = vrot.lane.b32.xlu1 %v873_v63, %s4601_s2 }
 0xa28   :  { %v876_v0 = vpop.permute.xlu1 %875 }
 0xa29   :  { %v878_v1 = vadd.f32 %v876_v0, %v784_v55 }
 0xa2b   :  { %4456 = vtanh.f32 %v878_v1 }
 0xa38   :  { %v4457_v2 = vpop.eup %4456 }
 0xa39   :  { %882 = vrot.lane.b32.xlu0 %v4457_v2, %s4602_s25 }
 0xaab   :  { %v883_v5 = vpop.permute.xlu0 %882 }
 0xaac   :  { %v885_v7 = vmul.f32 %v883_v5, %v880_v4 }
 0xaae   :  { %v887_v9 = vadd.f32 %v886_v58, %v885_v7  ;;  %v4991_v58 = vmax.f32 %v4796_v25, 0.0 }
 0xab0   :  { %962 = vrot.lane.b32.xlu1 %v887_v9, %s4602_s25 }
 0xb22   :  { %v963_v14 = vpop.permute.xlu1 %962 }
 0xb23   :  { %4170 = vmatmul.mubr.msk.f32.vlgmr.msra.gmra.mxu0 %vm266_vm3, %v963_v14 }
 0xb24   :  { %4191 = vmatpush3.msra.mxu0 %v4764_v12  ;;  %4194 = vmatprep.mubr.msk.f32.mxu0 %vm4600_vm1, %v4599_v3 }
 0xb25   :  { %4192 = vmatprep.subr.mxu0 %v4599_v3 }
 0xb26   :  { %4193 = vmatpush3.msra.mxu0 %v4772_v13 }
 0xb27   :  { %4195 = vmatmul.mubr.msk.f32.vlgmr.msra.gmra.mxu0 %vm192_vm2, %v1236_v15  ;;  %4197 = vmatprep.subr.mxu0 %v4599_v3 }
 0xb28   :  { %4198 = vmatpush3.msra.mxu0 %v4721_v6  ;;  %4205 = vmatprep.mubr.msk.f32.mxu0 %vm4600_vm1, %v4599_v3 }
 0xb29   :  { %4199 = vmatprep.subr.mxu0 %v4599_v3 }
 0xb2a   :  { %4200 = vmatpush3.msra.mxu0 %v4731_v8 }
 0xb2b   :  { %4201 = vmatprep.subr.mxu0 %v4599_v3 }
 0xb2c   :  { %4202 = vmatpush3.msra.mxu0 %v4742_v10 }
 0xb2d   :  { %4203 = vmatprep.subr.mxu0 %v4599_v3 }
 0xb2e   :  { %4204 = vmatpush3.msra.mxu0 %v4750_v11 }
 0xb2f   :  { %4226 = vmatprep.subr.mxu0 %v4599_v3 }
 0xbe3   :  { %v1032_v17 = vpop.f32.mrf.mxu0 }
 0xbe4   :  { %v1033_v18 = vadd.f32 %v1032_v17, %v4791_v23 }
 0xbe5   :  { %v4171_v19 = vpop.f32.mrf.mxu0 }
 0xbe6   :  { %1044 = vrot.lane.b32.xlu0 %v1033_v18, %s4601_s2  ;;  %v1036_v27 = vadd.f32 %v1033_v18, %v958_v26 }
 0xbe7   :  { %v4951_v22 = vpop.f32.mrf.mxu0 }
 0xbe8   :  { %v3864_v31 = vmul.f32 -1.442695, %v1036_v27  ;;  %v1306_v18 = vadd.f32 %v4951_v22, %v4834_v30 }
 0xbe9   :  { %v4196_v16 = vpop.f32.mrf.mxu0 }
 0xbea   :  { %4458 = vpow2.f32 %v3864_v31 }
 0xbf7   :  { %v4459_v32 = vpop.eup %4458 }
 0xbf8   :  { %v1040_v33 = vadd.f32 1.0, %v4459_v32 }
 0xbfa   :  { %4460 = vrcp.f32 %v1040_v33 }
 0xc07   :  { %v4461_v34 = vpop.eup %4460 }
 0xc08   :  { %v1054_v41 = vsub.f32 1.0, %v4461_v34  ;;  %v1060_v28 = vmul.f32 %v4461_v34, %v887_v9 }
 0xc58   :  { %v1045_v35 = vpop.permute.xlu0 %1044 }
 0xc59   :  { %v1047_v36 = vmul.f32 %v4461_v34, %v1045_v35 }
 0xc5b   :  { %1049 = vrot.lane.b32.xlu1 %v1047_v36, %s4601_s2 }
 0xccd   :  { %v1050_v37 = vpop.permute.xlu1 %1049 }
 0xcce   :  { %v1052_v39 = vadd.f32 %v1050_v37, %v958_v26 }
 0xcd0   :  { %4462 = vtanh.f32 %v1052_v39 }
 0xcdd   :  { %v4463_v40 = vpop.eup %4462 }
 0xcde   :  { %1056 = vrot.lane.b32.xlu0 %v4463_v40, %s4602_s25 }
 0xd50   :  { %v1057_v42 = vpop.permute.xlu0 %1056 }
 0xd51   :  { %v1059_v43 = vmul.f32 %v1057_v42, %v1054_v41 }
 0xd53   :  { %v1061_v44 = vadd.f32 %v1060_v28, %v1059_v43  ;;  %v1758_v28 = vrot.slane %v4991_v58, 2 }
 0xd55   :  { %1136 = vrot.lane.b32.xlu1 %v1061_v44, %s4602_s25 }
 0xdc7   :  { %v1137_v45 = vpop.permute.xlu1 %1136 }
 0xdc8   :  { %4188 = vmatmul.mubr.msk.f32.vlgmr.msra.gmra.mxu1 %vm266_vm3, %v1137_v45 }
 0xdc9   :  { %4209 = vmatpush3.msra.mxu1 %v4764_v12  ;;  %4212 = vmatprep.mubr.msk.f32.mxu1 %vm4600_vm1, %v4599_v3 }
 0xdca   :  { %4210 = vmatprep.subr.mxu1 %v4599_v3 }
 0xdcb   :  { %4211 = vmatpush3.msra.mxu1 %v4772_v13 }
 0xdcc   :  { %4213 = vmatmul.mubr.msk.f32.vlgmr.msra.gmra.mxu1 %vm192_vm2, %v1410_v38  ;;  %4215 = vmatprep.subr.mxu1 %v4599_v3 }
 0xdcd   :  { %4216 = vmatpush3.msra.mxu1 %v4721_v6  ;;  %4223 = vmatprep.mubr.msk.f32.mxu1 %vm4600_vm1, %v4599_v3 }
 0xdce   :  { %4217 = vmatprep.subr.mxu1 %v4599_v3 }
 0xdcf   :  { %4218 = vmatpush3.msra.mxu1 %v4731_v8 }
 0xdd0   :  { %4219 = vmatprep.subr.mxu1 %v4599_v3 }
 0xdd1   :  { %4220 = vmatpush3.msra.mxu1 %v4742_v10 }
 0xdd2   :  { %4221 = vmatprep.subr.mxu1 %v4599_v3 }
 0xdd3   :  { %4222 = vmatpush3.msra.mxu1 %v4750_v11 }
 0xdd4   :  { %4244 = vmatprep.subr.mxu1 %v4599_v3 }
 0xe88   :  { %v1206_v46 = vpop.f32.mrf.mxu1 }
 0xe89   :  { %v1207_v47 = vadd.f32 %v1206_v46, %v4791_v23 }
 0xe8a   :  { %v4189_v48 = vpop.f32.mrf.mxu1 }
 0xe8b   :  { %1218 = vrot.lane.b32.xlu0 %v1207_v47, %s4601_s2  ;;  %v1210_v52 = vadd.f32 %v1207_v47, %v1132_v51 }
 0xe8c   :  { %v4979_v49 = vpop.f32.mrf.mxu1 }
 0xe8d   :  { %v3867_v54 = vmul.f32 -1.442695, %v1210_v52  ;;  %v1480_v47 = vadd.f32 %v4979_v49, %v4834_v30 }
 0xe8e   :  { %v4214_v50 = vpop.f32.mrf.mxu1 }
 0xe8f   :  { %4464 = vpow2.f32 %v3867_v54 }
 0xe9c   :  { %v4465_v55 = vpop.eup %4464 }
 0xe9d   :  { %v1214_v56 = vadd.f32 1.0, %v4465_v55 }
 0xe9f   :  { %4466 = vrcp.f32 %v1214_v56 }
 0xeac   :  { %v4467_v57 = vpop.eup %4466 }
 0xead   :  { %v1228_v0 = vsub.f32 1.0, %v4467_v57  ;;  %v1234_v53 = vmul.f32 %v4467_v57, %v1061_v44 }
 0xefd   :  { %v1219_v59 = vpop.permute.xlu0 %1218 }
 0xefe   :  { %v1221_v60 = vmul.f32 %v4467_v57, %v1219_v59 }
 0xf00   :  { %1223 = vrot.lane.b32.xlu1 %v1221_v60, %s4601_s2 }
 0xf72   :  { %v1224_v61 = vpop.permute.xlu1 %1223 }
 0xf73   :  { %v1226_v62 = vadd.f32 %v1224_v61, %v1132_v51 }
 0xf75   :  { %4468 = vtanh.f32 %v1226_v62 }
 0xf82   :  { %v4469_v63 = vpop.eup %4468 }
 0xf83   :  { %1230 = vrot.lane.b32.xlu0 %v4469_v63, %s4602_s25 }
 0xff5   :  { %v1231_v1 = vpop.permute.xlu0 %1230 }
 0xff6   :  { %v1233_v2 = vmul.f32 %v1231_v1, %v1228_v0 }
 0xff8   :  { %v1235_v4 = vadd.f32 %v1234_v53, %v1233_v2  ;;  %v1932_v53 = vrot.slane %v4991_v58, 4 }
 0xffa   :  { %1310 = vrot.lane.b32.xlu1 %v1235_v4, %s4602_s25 }
0x106c   :  { %v1311_v5 = vpop.permute.xlu1 %1310 }
0x106d   :  { %4206 = vmatmul.mubr.msk.f32.vlgmr.msra.gmra.mxu0 %vm266_vm3, %v1311_v5 }
0x106e   :  { %4227 = vmatpush3.msra.mxu0 %v4764_v12  ;;  %4230 = vmatprep.mubr.msk.f32.mxu0 %vm4600_vm1, %v4599_v3 }
0x106f   :  { %4228 = vmatprep.subr.mxu0 %v4599_v3 }
0x1070   :  { %4229 = vmatpush3.msra.mxu0 %v4772_v13 }
0x1071   :  { %4231 = vmatmul.mubr.msk.f32.vlgmr.msra.gmra.mxu0 %vm192_vm2, %v4991_v58  ;;  %4233 = vmatprep.subr.mxu0 %v4599_v3 }
0x1072   :  { %4234 = vmatpush3.msra.mxu0 %v4721_v6  ;;  %4241 = vmatprep.mubr.msk.f32.mxu0 %vm4600_vm1, %v4599_v3 }
0x1073   :  { %4235 = vmatprep.subr.mxu0 %v4599_v3 }
0x1074   :  { %4236 = vmatpush3.msra.mxu0 %v4731_v8 }
0x1075   :  { %4237 = vmatprep.subr.mxu0 %v4599_v3 }
0x1076   :  { %4238 = vmatpush3.msra.mxu0 %v4742_v10 }
0x1077   :  { %4239 = vmatprep.subr.mxu0 %v4599_v3 }
0x1078   :  { %4240 = vmatpush3.msra.mxu0 %v4750_v11 }
0x1079   :  { %4262 = vmatprep.subr.mxu0 %v4599_v3 }
0x112d   :  { %v1380_v25 = vpop.f32.mrf.mxu0 }
0x112e   :  { %v1381_v7 = vadd.f32 %v1380_v25, %v4791_v23 }
0x112f   :  { %v4207_v9 = vpop.f32.mrf.mxu0 }
0x1130   :  { %1392 = vrot.lane.b32.xlu0 %v1381_v7, %s4601_s2  ;;  %v1384_v19 = vadd.f32 %v1381_v7, %v1306_v18 }
0x1131   :  { %v5010_v14 = vpop.f32.mrf.mxu0 }
0x1132   :  { %v3870_v16 = vmul.f32 -1.442695, %v1384_v19  ;;  %v1654_v9 = vadd.f32 %v5010_v14, %v4834_v30 }
0x1133   :  { %v4232_v17 = vpop.f32.mrf.mxu0 }
0x1134   :  { %4470 = vpow2.f32 %v3870_v16 }
0x1141   :  { %v4471_v26 = vpop.eup %4470 }
0x1142   :  { %v1388_v27 = vadd.f32 1.0, %v4471_v26 }
0x1144   :  { %4472 = vrcp.f32 %v1388_v27 }
0x1151   :  { %v4473_v31 = vpop.eup %4472 }
0x1152   :  { %v1402_v37 = vsub.f32 1.0, %v4473_v31  ;;  %v1408_v22 = vmul.f32 %v4473_v31, %v1235_v4 }
0x11a2   :  { %v1393_v32 = vpop.permute.xlu0 %1392 }
0x11a3   :  { %v1395_v33 = vmul.f32 %v4473_v31, %v1393_v32 }
0x11a5   :  { %1397 = vrot.lane.b32.xlu1 %v1395_v33, %s4601_s2 }
0x1217   :  { %v1398_v34 = vpop.permute.xlu1 %1397 }
0x1218   :  { %v1400_v35 = vadd.f32 %v1398_v34, %v1306_v18 }
0x121a   :  { %4474 = vtanh.f32 %v1400_v35 }
0x1227   :  { %v4475_v36 = vpop.eup %4474 }
0x1228   :  { %1404 = vrot.lane.b32.xlu0 %v4475_v36, %s4602_s25 }
0x129a   :  { %v1405_v39 = vpop.permute.xlu0 %1404 }
0x129b   :  { %v1407_v40 = vmul.f32 %v1405_v39, %v1402_v37 }
0x129d   :  { %v1409_v41 = vadd.f32 %v1408_v22, %v1407_v40  ;;  %v2106_v40 = vrot.slane %v4991_v58, 6 }
0x129f   :  { %1484 = vrot.lane.b32.xlu1 %v1409_v41, %s4602_s25 }
0x1311   :  { %v1485_v42 = vpop.permute.xlu1 %1484 }
0x1312   :  { %4224 = vmatmul.mubr.msk.f32.vlgmr.msra.gmra.mxu1 %vm266_vm3, %v1485_v42 }
0x1313   :  { %4245 = vmatpush3.msra.mxu1 %v4764_v12  ;;  %4248 = vmatprep.mubr.msk.f32.mxu1 %vm4600_vm1, %v4599_v3 }
0x1314   :  { %4246 = vmatprep.subr.mxu1 %v4599_v3 }
0x1315   :  { %4247 = vmatpush3.msra.mxu1 %v4772_v13 }
0x1316   :  { %4249 = vmatmul.mubr.msk.f32.vlgmr.msra.gmra.mxu1 %vm192_vm2, %v1758_v28  ;;  %4251 = vmatprep.subr.mxu1 %v4599_v3 }
0x1317   :  { %4252 = vmatpush3.msra.mxu1 %v4721_v6  ;;  %4259 = vmatprep.mubr.msk.f32.mxu1 %vm4600_vm1, %v4599_v3 }
0x1318   :  { %4253 = vmatprep.subr.mxu1 %v4599_v3 }
0x1319   :  { %4254 = vmatpush3.msra.mxu1 %v4731_v8 }
0x131a   :  { %4255 = vmatprep.subr.mxu1 %v4599_v3 }
0x131b   :  { %4256 = vmatpush3.msra.mxu1 %v4742_v10 }
0x131c   :  { %4257 = vmatprep.subr.mxu1 %v4599_v3 }
0x131d   :  { %4258 = vmatpush3.msra.mxu1 %v4750_v11 }
0x131e   :  { %4280 = vmatprep.subr.mxu1 %v4599_v3 }
0x13d2   :  { %v1554_v43 = vpop.f32.mrf.mxu1 }
0x13d3   :  { %v1555_v44 = vadd.f32 %v1554_v43, %v4791_v23 }
0x13d4   :  { %v4225_v45 = vpop.f32.mrf.mxu1 }
0x13d5   :  { %1566 = vrot.lane.b32.xlu0 %v1555_v44, %s4601_s2  ;;  %v1558_v48 = vadd.f32 %v1555_v44, %v1480_v47 }
0x13d6   :  { %v5038_v38 = vpop.f32.mrf.mxu1 }
0x13d7   :  { %v3873_v50 = vmul.f32 -1.442695, %v1558_v48 }
0x13d8   :  { %v4250_v46 = vpop.f32.mrf.mxu1 }
0x13d9   :  { %4476 = vpow2.f32 %v3873_v50 }
0x13e6   :  { %v4477_v51 = vpop.eup %4476 }
0x13e7   :  { %v1562_v52 = vadd.f32 1.0, %v4477_v51 }
0x13e9   :  { %4478 = vrcp.f32 %v1562_v52 }
0x13f6   :  { %v4479_v54 = vpop.eup %4478 }
0x13f7   :  { %v1576_v61 = vsub.f32 1.0, %v4479_v54  ;;  %v1582_v49 = vmul.f32 %v4479_v54, %v1409_v41 }
0x1447   :  { %v1567_v55 = vpop.permute.xlu0 %1566 }
0x1448   :  { %v1569_v56 = vmul.f32 %v4479_v54, %v1567_v55 }
0x144a   :  { %1571 = vrot.lane.b32.xlu1 %v1569_v56, %s4601_s2 }
0x14bc   :  { %v1572_v57 = vpop.permute.xlu1 %1571 }
0x14bd   :  { %v1574_v59 = vadd.f32 %v1572_v57, %v1480_v47 }
0x14bf   :  { %4480 = vtanh.f32 %v1574_v59 }
0x14cc   :  { %v4481_v60 = vpop.eup %4480 }
0x14cd   :  { %1578 = vrot.lane.b32.xlu0 %v4481_v60, %s4602_s25  ;;  %v5108_v60 = vmax.f32 %v4786_v21, 0.0  ;;  %v4557_v21 = vld [vmem:[%s5429_s4] sm:$0xff] }
0x153f   :  { %v1579_v62 = vpop.permute.xlu0 %1578 }
0x1540   :  { %v1581_v63 = vmul.f32 %v1579_v62, %v1576_v61  ;;  %v4554_v61 = vld [vmem:[%s5429_s4 + $0x18] sm:$0xff] }
0x1542   :  { %v1583_v0 = vadd.f32 %v1582_v49, %v1581_v63 }
0x1544   :  { %1658 = vrot.lane.b32.xlu1 %v1583_v0, %s4602_s25 }
0x15b6   :  { %v1659_v1 = vpop.permute.xlu1 %1658 }
0x15b7   :  { %4242 = vmatmul.mubr.msk.f32.vlgmr.msra.gmra.mxu0 %vm266_vm3, %v1659_v1 }
0x15b8   :  { %4263 = vmatpush3.msra.mxu0 %v4764_v12  ;;  %4266 = vmatprep.mubr.msk.f32.mxu0 %vm4600_vm1, %v4599_v3 }
0x15b9   :  { %4264 = vmatprep.subr.mxu0 %v4599_v3 }
0x15ba   :  { %4265 = vmatpush3.msra.mxu0 %v4772_v13 }
0x15bb   :  { %4267 = vmatmul.mubr.msk.f32.vlgmr.msra.gmra.mxu0 %vm192_vm2, %v1932_v53  ;;  %4269 = vmatprep.subr.mxu0 %v4599_v3 }
0x15bc   :  { %4270 = vmatpush3.msra.mxu0 %v4721_v6  ;;  %4277 = vmatprep.mubr.msk.f32.mxu0 %vm4600_vm1, %v4599_v3 }
0x15bd   :  { %4271 = vmatprep.subr.mxu0 %v4599_v3 }
0x15be   :  { %4272 = vmatpush3.msra.mxu0 %v4731_v8 }
0x15bf   :  { %4273 = vmatprep.subr.mxu0 %v4599_v3 }
0x15c0   :  { %4274 = vmatpush3.msra.mxu0 %v4742_v10 }
0x15c1   :  { %4275 = vmatprep.subr.mxu0 %v4599_v3 }
0x15c2   :  { %4276 = vmatpush3.msra.mxu0 %v4750_v11 }
0x15c3   :  { %4298 = vmatprep.subr.mxu0 %v4599_v3 }
0x1677   :  { %v1728_v2 = vpop.f32.mrf.mxu0 }
0x1678   :  { %v1729_v4 = vadd.f32 %v1728_v2, %v4791_v23 }
0x1679   :  { %v4243_v5 = vpop.f32.mrf.mxu0 }
0x167a   :  { %1740 = vrot.lane.b32.xlu0 %v1729_v4, %s4601_s2  ;;  %v1732_v17 = vadd.f32 %v1729_v4, %v1654_v9 }
0x167b   :  { %v5068_v25 = vpop.f32.mrf.mxu0 }
0x167c   :  { %v3876_v18 = vmul.f32 -1.442695, %v1732_v17  ;;  %v2002_v2 = vadd.f32 %v5068_v25, %v4834_v30 }
0x167d   :  { %v4268_v7 = vpop.f32.mrf.mxu0 }
0x167e   :  { %4482 = vpow2.f32 %v3876_v18 }
0x168b   :  { %v4483_v19 = vpop.eup %4482 }
0x168c   :  { %v1736_v16 = vadd.f32 1.0, %v4483_v19 }
0x168e   :  { %4484 = vrcp.f32 %v1736_v16 }
0x169b   :  { %v4485_v26 = vpop.eup %4484 }
0x169c   :  { %v1750_v35 = vsub.f32 1.0, %v4485_v26  ;;  %v1756_v14 = vmul.f32 %v4485_v26, %v1583_v0 }
0x16ec   :  { %v1741_v27 = vpop.permute.xlu0 %1740 }
0x16ed   :  { %v1743_v31 = vmul.f32 %v4485_v26, %v1741_v27 }
0x16ef   :  { %1745 = vrot.lane.b32.xlu1 %v1743_v31, %s4601_s2 }
0x1761   :  { %v1746_v32 = vpop.permute.xlu1 %1745 }
0x1762   :  { %v1748_v33 = vadd.f32 %v1746_v32, %v1654_v9 }
0x1764   :  { %4486 = vtanh.f32 %v1748_v33 }
0x1771   :  { %v4487_v34 = vpop.eup %4486 }
0x1772   :  { %1752 = vrot.lane.b32.xlu0 %v4487_v34, %s4602_s25  ;;  %v4558_v34 = vld [vmem:[%s5428_s3 + $0x8] sm:$0xff] }
0x17e4   :  { %v1753_v36 = vpop.permute.xlu0 %1752 }
0x17e5   :  { %v1755_v37 = vmul.f32 %v1753_v36, %v1750_v35  ;;  %v2454_v35 = vrot.slane %v5108_v60, 2  ;;  %v4559_v36 = vld [vmem:[%s5428_s3] sm:$0xff] }
0x17e7   :  { %v1757_v39 = vadd.f32 %v1756_v14, %v1755_v37  ;;  %v5164_v37 = vld [vmem:[%s5431_s6] sm:$0x3]  ;;  %s3911_s6 = sld [smem:[#allocation3 + $0x1]] }
0x17e9   :  { %1832 = vrot.lane.b32.xlu1 %v1757_v39, %s4602_s25 }
0x185b   :  { %v1833_v22 = vpop.permute.xlu1 %1832 }
0x185c   :  { %4260 = vmatmul.mubr.msk.f32.vlgmr.msra.gmra.mxu1 %vm266_vm3, %v1833_v22 }
0x185d   :  { %4281 = vmatpush3.msra.mxu1 %v4764_v12  ;;  %4284 = vmatprep.mubr.msk.f32.mxu1 %vm4600_vm1, %v4599_v3 }
0x185e   :  { %4282 = vmatprep.subr.mxu1 %v4599_v3 }
0x185f   :  { %4283 = vmatpush3.msra.mxu1 %v4772_v13 }
0x1860   :  { %4285 = vmatmul.mubr.msk.f32.vlgmr.msra.gmra.mxu1 %vm192_vm2, %v2106_v40  ;;  %4287 = vmatprep.subr.mxu1 %v4599_v3 }
0x1861   :  { %4288 = vmatpush3.msra.mxu1 %v4721_v6  ;;  %4295 = vmatprep.mubr.msk.f32.mxu1 %vm4600_vm1, %v4599_v3 }
0x1862   :  { %4289 = vmatprep.subr.mxu1 %v4599_v3 }
0x1863   :  { %4290 = vmatpush3.msra.mxu1 %v4731_v8  ;;  %v1828_v8 = vadd.f32 %v5038_v38, %v4834_v30 }
0x1864   :  { %4291 = vmatprep.subr.mxu1 %v4599_v3 }
0x1865   :  { %4292 = vmatpush3.msra.mxu1 %v4742_v10 }
0x1866   :  { %4293 = vmatprep.subr.mxu1 %v4599_v3 }
0x1867   :  { %4294 = vmatpush3.msra.mxu1 %v4750_v11 }
0x1868   :  { %4316 = vmatprep.subr.mxu1 %v4599_v3 }
0x191c   :  { %v1902_v41 = vpop.f32.mrf.mxu1 }
0x191d   :  { %v1903_v6 = vadd.f32 %v1902_v41, %v4791_v23 }
0x191e   :  { %v4261_v42 = vpop.f32.mrf.mxu1 }
0x191f   :  { %1914 = vrot.lane.b32.xlu0 %v1903_v6, %s4601_s2  ;;  %v1906_v44 = vadd.f32 %v1903_v6, %v1828_v8  ;;  %v5173_v6 = vld [vmem:[%s5430_s5] sm:$0x3]  ;;  %s4606_s5 = smov 24  }
0x1920   :  { %v5096_v28 = vpop.f32.mrf.mxu1 }
0x1921   :  { %v3879_v10 = vmul.f32 -1.442695, %v1906_v44  ;;  %v2176_v42 = vadd.f32 %v5173_v6, %v5096_v28 }
0x1922   :  { %v4286_v43 = vpop.f32.mrf.mxu1 }
0x1923   :  { %4488 = vpow2.f32 %v3879_v10 }
0x1930   :  { %v4489_v45 = vpop.eup %4488 }
0x1931   :  { %v1910_v46 = vadd.f32 1.0, %v4489_v45 }
0x1933   :  { %4490 = vrcp.f32 %v1910_v46 }
0x1940   :  { %v4491_v11 = vpop.eup %4490 }
0x1941   :  { %v1924_v54 = vsub.f32 1.0, %v4491_v11  ;;  %v1930_v38 = vmul.f32 %v4491_v11, %v1757_v39 }
0x1991   :  { %v1915_v47 = vpop.permute.xlu0 %1914 }
0x1992   :  { %v1917_v48 = vmul.f32 %v4491_v11, %v1915_v47 }
0x1994   :  { %1919 = vrot.lane.b32.xlu1 %v1917_v48, %s4601_s2 }
0x1a06   :  { %v1920_v50 = vpop.permute.xlu1 %1919 }
0x1a07   :  { %v1922_v51 = vadd.f32 %v1920_v50, %v1828_v8 }
0x1a09   :  { %4492 = vtanh.f32 %v1922_v51 }
0x1a16   :  { %v4493_v52 = vpop.eup %4492 }
0x1a17   :  { %1926 = vrot.lane.b32.xlu0 %v4493_v52, %s4602_s25 }
0x1a89   :  { %v1927_v55 = vpop.permute.xlu0 %1926 }
0x1a8a   :  { %v1929_v56 = vmul.f32 %v1927_v55, %v1924_v54 }
0x1a8c   :  { %v1931_v57 = vadd.f32 %v1930_v38, %v1929_v56  ;;  %v5186_v38 = vld [vmem:[%s5432_s7 + $0x8] sm:$0xff] }
0x1a8e   :  { %2006 = vrot.lane.b32.xlu1 %v1931_v57, %s4602_s25 }
0x1b00   :  { %v2007_v59 = vpop.permute.xlu1 %2006 }
0x1b01   :  { %4278 = vmatmul.mubr.msk.f32.vlgmr.msra.gmra.mxu0 %vm266_vm3, %v2007_v59  ;;  %v5201_v59 = vld [vmem:[%s5433_s8] sm:$0xff] }
0x1b02   :  { %4299 = vmatpush3.msra.mxu0 %v4764_v12  ;;  %4302 = vmatprep.mubr.msk.f32.mxu0 %vm4600_vm1, %v4599_v3  ;;  %v4555_v12 = vld [vmem:[%s5429_s4 + $0x10] sm:$0xff] }
0x1b03   :  { %4300 = vmatprep.subr.mxu0 %v4599_v3 }
0x1b04   :  { %4301 = vmatpush3.msra.mxu0 %v4772_v13  ;;  %v4556_v13 = vld [vmem:[%s5429_s4 + $0x8] sm:$0xff] }
0x1b05   :  { %4303 = vmatmul.mubr.msk.f32.vlgmr.msra.gmra.mxu0 %vm192_vm2, %v5108_v60  ;;  %4305 = vmatprep.subr.mxu0 %v4599_v3 }
0x1b06   :  { %4306 = vmatpush3.msra.mxu0 %v4554_v61  ;;  %4313 = vmatprep.mubr.msk.f32.mxu0 %vm4600_vm1, %v4599_v3 }
0x1b07   :  { %4307 = vmatprep.subr.mxu0 %v4599_v3 }
0x1b08   :  { %4308 = vmatpush3.msra.mxu0 %v4555_v12 }
0x1b09   :  { %4309 = vmatprep.subr.mxu0 %v4599_v3 }
0x1b0a   :  { %4310 = vmatpush3.msra.mxu0 %v4556_v13 }
0x1b0b   :  { %4311 = vmatprep.subr.mxu0 %v4599_v3 }
0x1b0c   :  { %4312 = vmatpush3.msra.mxu0 %v4557_v21 }
0x1b0d   :  { %4334 = vmatprep.subr.mxu0 %v4599_v3 }
0x1bc1   :  { %v2076_v62 = vpop.f32.mrf.mxu0 }
0x1bc2   :  { %v2077_v49 = vadd.f32 %v2076_v62, %v4791_v23 }
0x1bc3   :  { %v4279_v63 = vpop.f32.mrf.mxu0 }
0x1bc4   :  { %2088 = vrot.lane.b32.xlu0 %v2077_v49, %s4601_s2  ;;  %v2080_v4 = vadd.f32 %v2077_v49, %v2002_v2 }
0x1bc5   :  { %v5135_v0 = vpop.f32.mrf.mxu0 }
0x1bc6   :  { %v3882_v5 = vmul.f32 -1.442695, %v2080_v4  ;;  %v5231_v4 = vld [vmem:[%s5434_s9] sm:$0xf]  ;;  %s4604_s9 = smov 16  }
0x1bc7   :  { %v4304_v1 = vpop.f32.mrf.mxu0 }
0x1bc8   :  { %4494 = vpow2.f32 %v3882_v5  ;;  %v2350_v1 = vadd.f32 %v5173_v6, %v5135_v0 }
0x1bd5   :  { %v4495_v7 = vpop.eup %4494 }
0x1bd6   :  { %v2084_v9 = vadd.f32 1.0, %v4495_v7 }
0x1bd8   :  { %4496 = vrcp.f32 %v2084_v9 }
0x1be5   :  { %v4497_v17 = vpop.eup %4496 }
0x1be6   :  { %v2098_v27 = vsub.f32 1.0, %v4497_v17  ;;  %v2104_v30 = vmul.f32 %v4497_v17, %v1931_v57  ;;  %v5192_v57 = vld [vmem:[%s5432_s7] sm:$0xff] }
0x1c36   :  { %v2089_v18 = vpop.permute.xlu0 %2088 }
0x1c37   :  { %v2091_v19 = vmul.f32 %v4497_v17, %v2089_v18 }
0x1c39   :  { %2093 = vrot.lane.b32.xlu1 %v2091_v19, %s4601_s2 }
0x1cab   :  { %v2094_v23 = vpop.permute.xlu1 %2093 }
0x1cac   :  { %v2096_v16 = vadd.f32 %v2094_v23, %v2002_v2 }
0x1cae   :  { %4498 = vtanh.f32 %v2096_v16 }
0x1cbb   :  { %v4499_v26 = vpop.eup %4498 }
0x1cbc   :  { %2100 = vrot.lane.b32.xlu0 %v4499_v26, %s4602_s25 }
0x1d2e   :  { %v2101_v31 = vpop.permute.xlu0 %2100 }
0x1d2f   :  { %v2103_v25 = vmul.f32 %v2101_v31, %v2098_v27 }
0x1d31   :  { %v2105_v32 = vadd.f32 %v2104_v30, %v2103_v25 }
0x1d33   :  { %2180 = vrot.lane.b32.xlu1 %v2105_v32, %s4602_s25 }
0x1da5   :  { %v2181_v33 = vpop.permute.xlu1 %2180 }
0x1da6   :  { %4296 = vmatmul.mubr.msk.f32.vlgmr.msra.gmra.mxu1 %vm266_vm3, %v2181_v33 }
0x1da7   :  { %4317 = vmatpush3.msra.mxu1 %v4558_v34  ;;  %4320 = vmatprep.mubr.msk.f32.mxu1 %vm4600_vm1, %v4599_v3 }
0x1da8   :  { %4318 = vmatprep.subr.mxu1 %v4599_v3 }
0x1da9   :  { %4319 = vmatpush3.msra.mxu1 %v4559_v36 }
0x1daa   :  { %4321 = vmatmul.mubr.msk.f32.vlgmr.msra.gmra.mxu1 %vm192_vm2, %v2454_v35  ;;  %4323 = vmatprep.subr.mxu1 %v4599_v3 }
0x1dab   :  { %4324 = vmatpush3.msra.mxu1 %v4554_v61  ;;  %4331 = vmatprep.mubr.msk.f32.mxu1 %vm4600_vm1, %v4599_v3 }
0x1dac   :  { %4325 = vmatprep.subr.mxu1 %v4599_v3 }
0x1dad   :  { %4326 = vmatpush3.msra.mxu1 %v4555_v12 }
0x1dae   :  { %4327 = vmatprep.subr.mxu1 %v4599_v3 }
0x1daf   :  { %4328 = vmatpush3.msra.mxu1 %v4556_v13 }
0x1db0   :  { %4329 = vmatprep.subr.mxu1 %v4599_v3 }
0x1db1   :  { %4330 = vmatpush3.msra.mxu1 %v4557_v21  ;;  %v5222_v21 = vld [vmem:[%s5435_s10] sm:$0xf]  ;;  %s4605_s10 = smov 120  }
0x1db2   :  { %4346 = vmatprep.subr.mxu1 %v4599_v3 }
0x1e66   :  { %v2250_v14 = vpop.f32.mrf.mxu1 }
0x1e67   :  { %v2251_v39 = vadd.f32 %v5164_v37, %v2250_v14 }
0x1e68   :  { %v4297_v22 = vpop.f32.mrf.mxu1 }
0x1e69   :  { %2262 = vrot.lane.b32.xlu0 %v2251_v39, %s4601_s2  ;;  %v2254_v43 = vadd.f32 %v2251_v39, %v2176_v42 }
0x1e6a   :  { %v5168_v40 = vpop.f32.mrf.mxu1 }
0x1e6b   :  { %v3885_v8 = vmul.f32 -1.442695, %v2254_v43 }
0x1e6c   :  { %v4322_v41 = vpop.f32.mrf.mxu1 }
0x1e6d   :  { %4500 = vpow2.f32 %v3885_v8 }
0x1e7a   :  { %v4501_v44 = vpop.eup %4500 }
0x1e7b   :  { %v2258_v10 = vadd.f32 1.0, %v4501_v44 }
0x1e7d   :  { %4502 = vrcp.f32 %v2258_v10 }
0x1e8a   :  { %v4503_v45 = vpop.eup %4502 }
0x1e8b   :  { %v2272_v51 = vsub.f32 1.0, %v4503_v45  ;;  %v2278_v28 = vmul.f32 %v4503_v45, %v2105_v32 }
0x1edb   :  { %v2263_v46 = vpop.permute.xlu0 %2262 }
0x1edc   :  { %v2265_v11 = vmul.f32 %v4503_v45, %v2263_v46 }
0x1ede   :  { %2267 = vrot.lane.b32.xlu1 %v2265_v11, %s4601_s2 }
0x1f50   :  { %v2268_v47 = vpop.permute.xlu1 %2267 }
0x1f51   :  { %v2270_v48 = vadd.f32 %v2268_v47, %v2176_v42 }
0x1f53   :  { %4504 = vtanh.f32 %v2270_v48 }
0x1f60   :  { %v4505_v50 = vpop.eup %4504 }
0x1f61   :  { %2274 = vrot.lane.b32.xlu0 %v4505_v50, %s4602_s25 }
0x1fd3   :  { %v2275_v52 = vpop.permute.xlu0 %2274 }
0x1fd4   :  { %v2277_v54 = vmul.f32 %v2275_v52, %v2272_v51 }
0x1fd6   :  { %v5179_v55 = vadd.f32 %v2278_v28, %v2277_v54 }
0x1fd8   :  { %2354 = vrot.lane.b32.xlu1 %v5179_v55, %s4602_s25 }
0x204a   :  { %v2355_v56 = vpop.permute.xlu1 %2354 }
0x204b   :  { %4314 = vmatmul.mubr.msk.f32.vlgmr.msra.gmra.mxu0 %vm266_vm3, %v2355_v56 }
0x204c   :  { %4335 = vmatpush3.msra.mxu0 %v5186_v38  ;;  %4338 = vmatprep.mubr.msk.f32.mxu0 %vm4600_vm1, %v4599_v3 }
0x204d   :  { %4336 = vmatprep.subr.mxu0 %v4599_v3 }
0x204e   :  { %4337 = vmatpush3.msra.mxu0 %v5192_v57 }
0x204f   :  { %4341 = vmatprep.subr.mxu0 %v4599_v3  ;;  %4339 = vmatmul.mubr.msk.f32.vlgmr.msra.gmra.mxu0 %vm192_vm2, %v540_v29 }
0x2050   :  { %4342 = vmatpush3.msra.mxu0 %v5201_v59  ;;  %4343 = vmatprep.mubr.msk.f32.mxu0 %vm4600_vm1, %v4599_v3 }
0x2051   :  { %4353 = vmatprep.subr.mxu0 %v4599_v3 }
0x2053   :  { %4344 = vmatmul.mubr.f32.vlgmr.msra.gmra.mxu0 %v4599_v3 }
0x2054   :  { %4354 = vmatpush3.msra.mxu0 %v5201_v59  ;;  %4355 = vmatprep.mubr.msk.f32.mxu0 %vm4600_vm1, %v4599_v3 }
0x2055   :  { %4365 = vmatprep.subr.mxu0 %v4599_v3 }
0x210b   :  { %v2424_v61 = vpop.f32.mrf.mxu0 }
0x210c   :  { %v2425_v20 = vadd.f32 %v5164_v37, %v2424_v61 }
0x210d   :  { %v4315_v29 = vpop.f32.mrf.mxu0 }
0x210e   :  { %2436 = vrot.lane.b32.xlu1 %v2425_v20, %s4601_s2  ;;  %v2428_v2 = vadd.f32 %v2425_v20, %v2350_v1 }
0x210f   :  { %v2699_v12 = vpop.f32.mrf.mxu0 }
0x2110   :  { %v3888_v5 = vmul.f32 -1.442695, %v2428_v2  ;;  %v2700_v7 = vadd.f32 %v2699_v12, %v5231_v4 }
0x2111   :  { %v4340_v13 = vpop.f32.mrf.mxu0 }
0x2112   :  { %4506 = vpow2.f32 %v3888_v5 }
0x2113   :  { %v2772_v62 = vpop.f32.mrf.mxu0 }
0x2114   :  { %v2773_v49 = vadd.f32 %v2772_v62, %v5222_v21 }
0x2115   :  { %v4345_v63 = vpop.f32.mrf.mxu0 }
0x2116   :  { %2784 = vrot.lane.b32.xlu0 %v2773_v49, %s4603_s28  ;;  %v2776_v9 = vadd.f32 %v2773_v49, %v2700_v7 }
0x2118   :  { %v3893_v17 = vmul.f32 -1.442695, %v2776_v9 }
0x211a   :  { %4508 = vpow2.f32 %v3893_v17 }
0x211f   :  { %v4507_v18 = vpop.eup %4506 }
0x2120   :  { %v2432_v19 = vadd.f32 1.0, %v4507_v18 }
0x2122   :  { %4510 = vrcp.f32 %v2432_v19 }
0x2127   :  { %v4509_v23 = vpop.eup %4508 }
0x2128   :  { %v2780_v16 = vadd.f32 1.0, %v4509_v23 }
0x212a   :  { %4512 = vrcp.f32 %v2780_v16 }
0x212f   :  { %v4511_v0 = vpop.eup %4510 }
0x2130   :  { %v2446_v39 = vsub.f32 1.0, %v4511_v0  ;;  %v2452_v41 = vmul.f32 %v4511_v0, %v5179_v55 }
0x2137   :  { %v4513_v31 = vpop.eup %4512 }
0x2138   :  { %v2794_v8 = vsub.f32 1.0, %v4513_v31  ;;  %v2800_v10 = vmul.f32 0.0, %v4513_v31 }
0x2180   :  { %v2437_v26 = vpop.permute.xlu1 %2436 }
0x2181   :  { %v2439_v27 = vmul.f32 %v4511_v0, %v2437_v26 }
0x2183   :  { %2441 = vrot.lane.b32.xlu1 %v2439_v27, %s4601_s2 }
0x2188   :  { %v2785_v30 = vpop.permute.xlu0 %2784 }
0x2189   :  { %v2787_v25 = vmul.f32 %v4513_v31, %v2785_v30 }
0x218b   :  { %2789 = vrot.lane.b32.xlu0 %v2787_v25, %s4604_s9 }
0x21f5   :  { %v2442_v32 = vpop.permute.xlu1 %2441 }
0x21f6   :  { %v2444_v33 = vadd.f32 %v2442_v32, %v2350_v1 }
0x21f8   :  { %4514 = vtanh.f32 %v2444_v33 }
0x21fd   :  { %v2790_v34 = vpop.permute.xlu0 %2789 }
0x21fe   :  { %v2792_v35 = vadd.f32 %v2790_v34, %v2700_v7 }
0x2200   :  { %4516 = vtanh.f32 %v2792_v35 }
0x2205   :  { %v4515_v36 = vpop.eup %4514 }
0x2206   :  { %2448 = vrot.lane.b32.xlu1 %v4515_v36, %s4602_s25 }
0x220d   :  { %v4517_v14 = vpop.eup %4516 }
0x220e   :  { %2796 = vrot.lane.b32.xlu0 %v4517_v14, %s4605_s10 }
0x2278   :  { %v2449_v22 = vpop.permute.xlu1 %2448 }
0x2279   :  { %v2451_v42 = vmul.f32 %v2449_v22, %v2446_v39 }
0x227b   :  { %v5239_v43 = vadd.f32 %v2452_v41, %v2451_v42 }
0x227d   :  { %2528 = vrot.lane.b32.xlu1 %v5239_v43, %s4602_s25 }
0x2280   :  { %v2797_v44 = vpop.permute.xlu0 %2796 }
0x2281   :  { %v2799_v45 = vmul.f32 %v2797_v44, %v2794_v8 }
0x2283   :  { %v5243_v46 = vadd.f32 %v2800_v10, %v2799_v45 }
0x2285   :  { %2873 = vrot.lane.b32.xlu0 %v5243_v46, %s4605_s10 }
0x22ef   :  { %v2529_v11 = vpop.permute.xlu1 %2528 }
0x22f0   :  { %4332 = vmatmul.mubr.msk.f32.vlgmr.msra.gmra.mxu1 %vm266_vm3, %v2529_v11 }
0x22f1   :  { %4347 = vmatpush3.msra.mxu1 %v5186_v38  ;;  %4350 = vmatprep.mubr.msk.f32.mxu1 %vm4600_vm1, %v4599_v3 }
0x22f2   :  { %4348 = vmatprep.subr.mxu1 %v4599_v3 }
0x22f3   :  { %4349 = vmatpush3.msra.mxu1 %v5192_v57 }
0x22f4   :  { %4351 = vmatmul.mubr.msk.f32.vlgmr.msra.gmra.mxu1 %vm192_vm2, %v4874_v24  ;;  %4358 = vmatprep.subr.mxu1 %v4599_v3 }
0x22f5   :  { %4359 = vmatpush3.msra.mxu1 %v5186_v38  ;;  %4362 = vmatprep.mubr.msk.f32.mxu1 %vm4600_vm1, %v4599_v3 }
0x22f6   :  { %4360 = vmatprep.subr.mxu1 %v4599_v3 }
0x22f7   :  { %4361 = vmatpush3.msra.mxu1 %v5192_v57  ;;  %v2874_v47 = vpop.permute.xlu0 %2873 }
0x22f8   :  { %4356 = vmatmul.mubr.msk.f32.vlgmr.msra.gmra.mxu0 %vm2703_vm4, %v2874_v47  ;;  %4363 = vmatmul.mubr.msk.f32.vlgmr.msra.gmra.mxu1 %vm192_vm2, %v1236_v15 }
0x22f9   :  { %4370 = vmatprep.subr.mxu1 %v4599_v3  ;;  %4374 = vmatprep.mubr.msk.f32.mxu1 %vm4600_vm1, %v4599_v3 }
0x22fa   :  { %4371 = vmatpush3.msra.mxu1 %v5186_v38  ;;  %4366 = vmatpush3.msra.mxu0 %v5201_v59 }
0x22fb   :  { %4372 = vmatprep.subr.mxu1 %v4599_v3  ;;  %4367 = vmatprep.mubr.msk.f32.mxu0 %vm4600_vm1, %v4599_v3 }
0x22fc   :  { %4373 = vmatpush3.msra.mxu1 %v5192_v57  ;;  %4377 = vmatprep.subr.mxu0 %v4599_v3 }
0x22fd   :  { %4375 = vmatmul.mubr.msk.f32.vlgmr.msra.gmra.mxu1 %vm192_vm2, %v4991_v58  ;;  %4382 = vmatprep.subr.mxu1 %v4599_v3 }
0x22fe   :  { %4383 = vmatpush3.msra.mxu1 %v5186_v38  ;;  %4386 = vmatprep.mubr.msk.f32.mxu1 %vm4600_vm1, %v4599_v3 }
0x22ff   :  { %4384 = vmatprep.subr.mxu1 %v4599_v3 }
0x2300   :  { %4385 = vmatpush3.msra.mxu1 %v5192_v57 }
0x2301   :  { %4387 = vmatmul.mubr.msk.f32.vlgmr.msra.gmra.mxu1 %vm192_vm2, %v1932_v53  ;;  %4394 = vmatprep.subr.mxu1 %v4599_v3 }
0x2302   :  { %4395 = vmatpush3.msra.mxu1 %v5186_v38  ;;  %4398 = vmatprep.mubr.msk.f32.mxu1 %vm4600_vm1, %v4599_v3 }
0x2303   :  { %4396 = vmatprep.subr.mxu1 %v4599_v3 }
0x2304   :  { %4397 = vmatpush3.msra.mxu1 %v5192_v57 }
0x2305   :  { %4399 = vmatmul.mubr.msk.f32.vlgmr.msra.gmra.mxu1 %vm192_vm2, %v5108_v60  ;;  %4406 = vmatprep.subr.mxu1 %v4599_v3 }
0x2306   :  { %4418 = vmatprep.mubr.msk.f32.mxu1 %vm4600_vm1, %v4599_v3 }
0x23b0   :  { %v5297_v24 = vpop.f32.mrf.mxu1 }
0x23b2   :  { %v4333_v15 = vpop.f32.mrf.mxu1 }
0x23b4   :  { %v2868_v58 = vpop.f32.mrf.mxu1 }
0x23b5   :  { %v2869_v61 = vadd.f32 %v2868_v58, %v5231_v4 }
0x23b6   :  { %v4352_v53 = vpop.f32.mrf.mxu1 }
0x23b8   :  { %v2943_v48 = vpop.f32.mrf.mxu0  ;;  %v3039_v50 = vpop.f32.mrf.mxu1 }
0x23b9   :  { %v2944_v51 = vadd.f32 %v2943_v48, %v5222_v21  ;;  %v3040_v27 = vadd.f32 %v3039_v50, %v5231_v4 }
0x23ba   :  { %v4357_v52 = vpop.f32.mrf.mxu0  ;;  %v4364_v28 = vpop.f32.mrf.mxu1 }
0x23bb   :  { %2955 = vrot.lane.b32.xlu0 %v2944_v51, %s4603_s28  ;;  %v2947_v20 = vadd.f32 %v2944_v51, %v2869_v61 }
0x23bd   :  { %v5301_v54 = vpop.f32.mrf.mxu1  ;;  %v3896_v29 = vmul.f32 -1.442695, %v2947_v20 }
0x23be   :  { %v3211_v47 = vadd.f32 %v5301_v54, %v5231_v4 }
0x23bf   :  { %v4376_v60 = vpop.f32.mrf.mxu1  ;;  %4518 = vpow2.f32 %v3896_v29 }
0x23c1   :  { %v5303_v55 = vpop.f32.mrf.mxu1 }
0x23c3   :  { %v4388_v38 = vpop.f32.mrf.mxu1 }
0x23c5   :  { %v5305_v56 = vpop.f32.mrf.mxu1 }
0x23c7   :  { %v4400_v57 = vpop.f32.mrf.mxu1 }
0x23cc   :  { %v4519_v12 = vpop.eup %4518 }
0x23cd   :  { %v2951_v13 = vadd.f32 1.0, %v4519_v12 }
0x23cf   :  { %4520 = vrcp.f32 %v2951_v13 }
0x23dc   :  { %v4521_v62 = vpop.eup %4520 }
0x23dd   :  { %v2965_v7 = vsub.f32 1.0, %v4521_v62  ;;  %v2971_v17 = vmul.f32 %v4521_v62, %v5243_v46 }
0x242d   :  { %v2956_v49 = vpop.permute.xlu0 %2955 }
0x242e   :  { %v2958_v63 = vmul.f32 %v4521_v62, %v2956_v49 }
0x2430   :  { %2960 = vrot.lane.b32.xlu1 %v2958_v63, %s4604_s9  ;;  %v3382_v63 = vadd.f32 %v5303_v55, %v5231_v4 }
0x24a2   :  { %v2961_v1 = vpop.permute.xlu1 %2960 }
0x24a3   :  { %v2963_v2 = vadd.f32 %v2961_v1, %v2869_v61 }
0x24a5   :  { %4522 = vtanh.f32 %v2963_v2 }
0x24b2   :  { %v4523_v5 = vpop.eup %4522 }
0x24b3   :  { %2967 = vrot.lane.b32.xlu0 %v4523_v5, %s4605_s10 }
0x2525   :  { %v2968_v9 = vpop.permute.xlu0 %2967 }
0x2526   :  { %v2970_v18 = vmul.f32 %v2968_v9, %v2965_v7 }
0x2528   :  { %v2972_v19 = vadd.f32 %v2971_v17, %v2970_v18 }
0x252a   :  { %3044 = vrot.lane.b32.xlu1 %v2972_v19, %s4605_s10 }
0x259c   :  { %v3045_v23 = vpop.permute.xlu1 %3044 }
0x259d   :  { %4368 = vmatmul.mubr.msk.f32.vlgmr.msra.gmra.mxu0 %vm2703_vm4, %v3045_v23 }
0x259e   :  { %4378 = vmatpush3.msra.mxu0 %v5201_v59  ;;  %4379 = vmatprep.mubr.msk.f32.mxu0 %vm4600_vm1, %v4599_v3 }
0x259f   :  { %4389 = vmatprep.subr.mxu0 %v4599_v3 }
0x265d   :  { %v3114_v16 = vpop.f32.mrf.mxu0 }
0x265e   :  { %v3115_v0 = vadd.f32 %v3114_v16, %v5222_v21 }
0x265f   :  { %v4369_v26 = vpop.f32.mrf.mxu0 }
0x2660   :  { %3126 = vrot.lane.b32.xlu0 %v3115_v0, %s4603_s28  ;;  %v3118_v31 = vadd.f32 %v3115_v0, %v3040_v27 }
0x2662   :  { %v3899_v30 = vmul.f32 -1.442695, %v3118_v31  ;;  %v2599_v31 = vadd.f32 %v5164_v37, %v5297_v24 }
0x2664   :  { %4524 = vpow2.f32 %v3899_v30  ;;  %v2524_v30 = vadd.f32 %v5173_v6, %v5168_v40 }
0x2671   :  { %v4525_v25 = vpop.eup %4524 }
0x2672   :  { %v3122_v32 = vadd.f32 1.0, %v4525_v25  ;;  %v2602_v25 = vadd.f32 %v2599_v31, %v2524_v30 }
0x2674   :  { %4526 = vrcp.f32 %v3122_v32  ;;  %v3891_v32 = vmul.f32 -1.442695, %v2602_v25  ;;  %v3778_v25 = vld [vmem:[%s5438_s13 + $0x2] sm:$0x1] }
0x2681   :  { %v4527_v33 = vpop.eup %4526 }
0x2682   :  { %v3136_v22 = vsub.f32 1.0, %v4527_v33  ;;  %v3142_v42 = vmul.f32 %v4527_v33, %v2972_v19 }
0x26d2   :  { %v3127_v34 = vpop.permute.xlu0 %3126 }
0x26d3   :  { %v3129_v35 = vmul.f32 %v4527_v33, %v3127_v34 }
0x26d5   :  { %3131 = vrot.lane.b32.xlu1 %v3129_v35, %s4604_s9 }
0x2747   :  { %v3132_v36 = vpop.permute.xlu1 %3131 }
0x2748   :  { %v3134_v14 = vadd.f32 %v3132_v36, %v3040_v27 }
0x274a   :  { %4528 = vtanh.f32 %v3134_v14 }
0x2757   :  { %v4529_v39 = vpop.eup %4528 }
0x2758   :  { %3138 = vrot.lane.b32.xlu0 %v4529_v39, %s4605_s10 }
0x27ca   :  { %v3139_v41 = vpop.permute.xlu0 %3138 }
0x27cb   :  { %v3141_v8 = vmul.f32 %v3139_v41, %v3136_v22 }
0x27cd   :  { %v3143_v44 = vadd.f32 %v3142_v42, %v3141_v8  ;;  %v3553_v42 = vadd.f32 %v5305_v56, %v5231_v4  ;;  %v3676_v4 = vld [vmem:[%s5436_s11 + $0x20] sm:$0xff] }
0x27cf   :  { %3215 = vrot.lane.b32.xlu1 %v3143_v44, %s4605_s10 }
0x2841   :  { %v3216_v10 = vpop.permute.xlu1 %3215 }
0x2842   :  { %4380 = vmatmul.mubr.msk.f32.vlgmr.msra.gmra.mxu0 %vm2703_vm4, %v3216_v10 }
0x2843   :  { %4390 = vmatpush3.msra.mxu0 %v5201_v59  ;;  %4391 = vmatprep.mubr.msk.f32.mxu0 %vm4600_vm1, %v4599_v3 }
0x2844   :  { %4401 = vmatprep.subr.mxu0 %v4599_v3 }
0x2902   :  { %v3285_v45 = vpop.f32.mrf.mxu0 }
0x2903   :  { %v3286_v46 = vadd.f32 %v3285_v45, %v5222_v21 }
0x2904   :  { %v4381_v11 = vpop.f32.mrf.mxu0 }
0x2905   :  { %3297 = vrot.lane.b32.xlu0 %v3286_v46, %s4603_s28  ;;  %v3289_v15 = vadd.f32 %v3286_v46, %v3211_v47 }
0x2907   :  { %v3902_v58 = vmul.f32 -1.442695, %v3289_v15 }
0x2909   :  { %4530 = vpow2.f32 %v3902_v58 }
0x2916   :  { %v4531_v53 = vpop.eup %4530 }
0x2917   :  { %v3293_v48 = vadd.f32 1.0, %v4531_v53  ;;  %v3675_v53 = vld [vmem:[%s5436_s11 + $0x18] sm:$0xff] }
0x2919   :  { %4532 = vrcp.f32 %v3293_v48 }
0x2926   :  { %v4533_v50 = vpop.eup %4532 }
0x2927   :  { %v3307_v57 = vsub.f32 1.0, %v4533_v50  ;;  %v3313_v54 = vmul.f32 %v4533_v50, %v3143_v44 }
0x2977   :  { %v3298_v51 = vpop.permute.xlu0 %3297 }
0x2978   :  { %v3300_v52 = vmul.f32 %v4533_v50, %v3298_v51  ;;  %v3674_v50 = vld [vmem:[%s5436_s11 + $0x10] sm:$0xff] }
0x297a   :  { %3302 = vrot.lane.b32.xlu1 %v3300_v52, %s4604_s9 }
0x29ec   :  { %v3303_v28 = vpop.permute.xlu1 %3302 }
0x29ed   :  { %v3305_v60 = vadd.f32 %v3303_v28, %v3211_v47 }
0x29ef   :  { %4534 = vtanh.f32 %v3305_v60 }
0x29fc   :  { %v4535_v38 = vpop.eup %4534 }
0x29fd   :  { %3309 = vrot.lane.b32.xlu0 %v4535_v38, %s4605_s10  ;;  %v3673_v38 = vld [vmem:[%s5436_s11 + $0x8] sm:$0xff] }
0x2a6f   :  { %v3310_v61 = vpop.permute.xlu0 %3309 }
0x2a70   :  { %v3312_v20 = vmul.f32 %v3310_v61, %v3307_v57  ;;  %v3672_v57 = vld [vmem:[%s5436_s11] sm:$0xff] }
0x2a72   :  { %v3314_v29 = vadd.f32 %v3313_v54, %v3312_v20 }
0x2a74   :  { %3386 = vrot.lane.b32.xlu1 %v3314_v29, %s4605_s10 }
0x2ae6   :  { %v3387_v12 = vpop.permute.xlu1 %3386 }
0x2ae7   :  { %4392 = vmatmul.mubr.msk.f32.vlgmr.msra.gmra.mxu0 %vm2703_vm4, %v3387_v12 }
0x2ae8   :  { %4402 = vmatpush3.msra.mxu0 %v5201_v59  ;;  %4403 = vmatprep.mubr.msk.f32.mxu0 %vm4600_vm1, %v4599_v3 }
0x2ba7   :  { %v3456_v13 = vpop.f32.mrf.mxu0 }
0x2ba8   :  { %v3457_v62 = vadd.f32 %v3456_v13, %v5222_v21 }
0x2ba9   :  { %v4393_v49 = vpop.f32.mrf.mxu0 }
0x2baa   :  { %3468 = vrot.lane.b32.xlu0 %v3457_v62, %s4603_s28  ;;  %v3460_v1 = vadd.f32 %v3457_v62, %v3382_v63 }
0x2bac   :  { %v3905_v2 = vmul.f32 -1.442695, %v3460_v1  ;;  %v3763_v1 = vld [vmem:[%s5438_s13 + $0x4] sm:$0x1] }
0x2bae   :  { %4536 = vpow2.f32 %v3905_v2 }
0x2bbb   :  { %v4537_v5 = vpop.eup %4536 }
0x2bbc   :  { %v3464_v7 = vadd.f32 1.0, %v4537_v5 }
0x2bbe   :  { %4538 = vrcp.f32 %v3464_v7  ;;  %v3760_v7 = vstv %s5440_s15 }
0x2bcb   :  { %v4539_v9 = vpop.eup %4538 }
0x2bcc   :  { %v3478_v16 = vsub.f32 1.0, %v4539_v9  ;;  %v3484_v55 = vmul.f32 %v4539_v9, %v3314_v29 }
0x2c1c   :  { %v3469_v59 = vpop.permute.xlu0 %3468 }
0x2c1d   :  { %v3471_v17 = vmul.f32 %v4539_v9, %v3469_v59  ;;  %v3762_v9 = vld [vmem:[%s5438_s13] sm:$0x1]  ;;  %v3771_v59 = vld [vmem:[%s5438_s13 + $0x5] sm:$0x1] }
0x2c1f   :  { %3473 = vrot.lane.b32.xlu1 %v3471_v17, %s4604_s9  ;;  %v3773_v17 = vstv %s3911_s6 }
0x2c91   :  { %v3474_v18 = vpop.permute.xlu1 %3473 }
0x2c92   :  { %v3476_v19 = vadd.f32 %v3474_v18, %v3382_v63 }
0x2c94   :  { %4540 = vtanh.f32 %v3476_v19 }
0x2c95   :  { %4542 = vpow2.f32 %v3891_v32  ;;  %v3787_v32 = vld [vmem:[%s5438_s13 + $0x7] sm:$0x1] }
0x2ca1   :  { %v4541_v23 = vpop.eup %4540 }
0x2ca2   :  { %3480 = vrot.lane.b32.xlu0 %v4541_v23, %s4605_s10  ;;  %v4543_v33 = vpop.eup %4542  ;;  %v3775_v23 = vmul.f32 %v3773_v17, %v3771_v59 }
0x2ca3   :  { %v2606_v34 = vadd.f32 1.0, %v4543_v33 }
0x2ca5   :  { %4544 = vrcp.f32 %v2606_v34 }
0x2cb2   :  { %v4545_v36 = vpop.eup %4544 }
0x2cb3   :  { %v2620_v48 = vsub.f32 1.0, %v4545_v36  ;;  %v2626_v28 = vmul.f32 %v4545_v36, %v5239_v43 }
0x2d14   :  { %v3481_v0 = vpop.permute.xlu0 %3480 }
0x2d15   :  { %v3483_v26 = vmul.f32 %v3481_v0, %v3478_v16  ;;  %v3770_v16 = vld [vmem:[%s5438_s13 + $0x1] sm:$0x1]  ;;  %v3779_v0 = vld [vmem:[%s5438_s13 + $0x6] sm:$0x1] }
0x2d17   :  { %v5345_v27 = vadd.f32 %v3484_v55, %v3483_v26  ;;  %v3781_v55 = vstv %s3912_s26 }
0x2d19   :  { %3557 = vrot.lane.b32.xlu1 %v5345_v27, %s4605_s10 }
0x2d1d   :  { %2610 = vrot.lane.b32.xlu1 %v2599_v31, %s4601_s2 }
0x2d8b   :  { %v3558_v35 = vpop.permute.xlu1 %3557 }
0x2d8c   :  { %4404 = vmatmul.mubr.msk.f32.vlgmr.msra.gmra.mxu0 %vm2703_vm4, %v3558_v35  ;;  %v3782_v35 = vmul.f32 %v3781_v55, %v3778_v25 }
0x2d8f   :  { %v2611_v14 = vpop.permute.xlu1 %2610 }
0x2d90   :  { %v2613_v39 = vmul.f32 %v4545_v36, %v2611_v14 }
0x2d92   :  { %2615 = vrot.lane.b32.xlu1 %v2613_v39, %s4601_s2  ;;  %v3786_v39 = vld [vmem:[%s5438_s13 + $0x3] sm:$0x1]  ;;  %s4609_s13 = smov [#allocation6]  }
0x2d93   :  { %s3834_s23 = sshll.u32 %s4609_s13, 4  ;;  %s3835_s23 = int_to_ptr.vmem [resolvable:$true] %s3834_s23 }
0x2d94   :  { %p4579_p6 = scmp.lt.s32.totalorder %s3835_s23, %s3835_s23 }
0x2e04   :  { %v2616_v37 = vpop.permute.xlu1 %2615 }
0x2e05   :  { %v2618_v24 = vadd.f32 %v2616_v37, %v2524_v30  ;;  %v3783_v30 = vmul.f32 %v3781_v55, %v3779_v0 }
0x2e07   :  { %4546 = vtanh.f32 %v2618_v24 }
0x2e14   :  { %v4547_v22 = vpop.eup %4546 }
0x2e15   :  { %2622 = vrot.lane.b32.xlu1 %v4547_v22, %s4602_s25 }
0x2e4c   :  { %v3627_v40 = vpop.f32.mrf.mxu0 }
0x2e4d   :  { %v3628_v6 = vadd.f32 %v3627_v40, %v5222_v21  ;;  %v3677_v21 = vld [vmem:[%s5436_s11 + $0x28] sm:$0xff]  ;;  %s3764_s11 = sld [smem:[#allocation3]]  ;;  %v4608_v40 = vmov 1966171168  }
0x2e4e   :  { %v4405_v41 = vpop.f32.mrf.mxu0  ;;  %4407 = vmatpush3.msra.mxu1 %v3677_v21 }
0x2e4f   :  { %3639 = vrot.lane.b32.xlu0 %v3628_v6, %s4603_s28  ;;  %v3631_v8 = vadd.f32 %v3628_v6, %v3553_v42  ;;  %4408 = vmatprep.subr.mxu1 %v4599_v3  ;;  %v3803_v6 = vunpack.c.l.s4 %v4608_v40  ;;  %v3805_v41 = vlaneseq }
0x2e50   :  { %4409 = vmatpush3.msra.mxu1 %v3676_v4 }
0x2e51   :  { %v3908_v44 = vmul.f32 -1.442695, %v3631_v8  ;;  %4410 = vmatprep.subr.mxu1 %v4599_v3 }
0x2e52   :  { %4411 = vmatpush3.msra.mxu1 %v3675_v53 }
0x2e53   :  { %4548 = vpow2.f32 %v3908_v44  ;;  %4412 = vmatprep.subr.mxu1 %v4599_v3  ;;  %v3765_v2 = vstv %s3764_s11  ;;  %v3804_v44 = vunpack.c.0.s8 %v3803_v6 }
0x2e54   :  { %4413 = vmatpush3.msra.mxu1 %v3674_v50  ;;  %v3767_v5 = vmul.f32 %v3765_v2, %v3763_v1  ;;  %v3766_v18 = vmul.f32 %v3765_v2, %v3762_v9 }
0x2e55   :  { %4414 = vmatprep.subr.mxu1 %v4599_v3 }
0x2e56   :  { %4415 = vmatpush3.msra.mxu1 %v3673_v38  ;;  %v3769_v19 = vadd.f32 %v3767_v5, %v3760_v7  ;;  %v3768_v26 = vadd.f32 %v3766_v18, %v3760_v7 }
0x2e57   :  { %4416 = vmatprep.subr.mxu1 %v4599_v3 }
0x2e58   :  { %4417 = vmatpush3.msra.mxu1 %v3672_v57  ;;  %v3777_v31 = vadd.f32 %v3775_v23, %v3769_v19 }
0x2e5a   :  { %v3785_v36 = vadd.f32 %v3783_v30, %v3777_v31 }
0x2e60   :  { %v4549_v10 = vpop.eup %4548 }
0x2e61   :  { %v3635_v45 = vadd.f32 1.0, %v4549_v10  ;;  %v3806_v10 = vshrl.u32 %v3805_v41, 7 }
0x2e63   :  { %4550 = vrcp.f32 %v3635_v45  ;;  %v3909_v45 = vld [vmem:[%s5437_s12] ss:$0 sm:$0xff] }
0x2e70   :  { %v4551_v46 = vpop.eup %4550 }
0x2e71   :  { %v3649_v43 = vsub.f32 1.0, %v4551_v46  ;;  %v3655_v54 = vmul.f32 %v4551_v46, %v5345_v27  ;;  %v3774_v27 = vmul.f32 %v3773_v17, %v3770_v16 }
0x2e73   :  { %v3776_v34 = vadd.f32 %v3774_v27, %v3768_v26 }
0x2e75   :  { %v3784_v37 = vadd.f32 %v3782_v35, %v3776_v34 }
0x2e87   :  { %v2623_v56 = vpop.permute.xlu1 %2622 }
0x2e88   :  { %v2625_v51 = vmul.f32 %v2623_v56, %v2620_v48 }
0x2e8a   :  { %v2627_v60 = vadd.f32 %v2626_v28, %v2625_v51 }
0x2ec1   :  { %v3640_v11 = vpop.permute.xlu0 %3639 }
0x2ec2   :  { %v3642_v47 = vmul.f32 %v4551_v46, %v3640_v11 }
0x2ec4   :  { %3644 = vrot.lane.b32.xlu0 %v3642_v47, %s4604_s9 }
0x2f36   :  { %v3645_v15 = vpop.permute.xlu0 %3644 }
0x2f37   :  { %v3647_v58 = vadd.f32 %v3645_v15, %v3553_v42  ;;  %v3807_v15 = vsub.s32 %v3804_v44, %v3806_v10 }
0x2f39   :  { %4552 = vtanh.f32 %v3647_v58 }
0x2f46   :  { %v4553_v52 = vpop.eup %4552 }
0x2f47   :  { %3651 = vrot.lane.b32.xlu0 %v4553_v52, %s4605_s10  ;;  %s3913_s10 = sld [smem:[#allocation3 + $0x3]] }
0x2f4b   :  { %3658 = vrot.lane.b32.xlu0 %v2627_v60, %s4602_s25  ;;  %s4607_s25 = smov 32  }
0x2f4d   :  { %v3789_v33 = vstv %s3913_s10 }
0x2f4e   :  { %v3791_v14 = vmul.f32 %v3789_v33, %v3787_v32  ;;  %v3790_v24 = vmul.f32 %v3789_v33, %v3786_v39 }
0x2f50   :  { %v3793_v22 = vadd.f32 %v3791_v14, %v3785_v36  ;;  %v3792_v42 = vadd.f32 %v3790_v24, %v3784_v37 }
0x2f52   :  { %v3796_v8 = vrot.slane %v3793_v22, 7 }
0x2f54   :  { %v3798_v11 = vsel %vm3797_vm7, %v3796_v8, %v3792_v42 }
0x2fb9   :  { %v3652_v61 = vpop.permute.xlu0 %3651 }
0x2fba   :  { %v3654_v20 = vmul.f32 %v3652_v61, %v3649_v43 }
0x2fbc   :  { %v3656_v29 = vadd.f32 %v3655_v54, %v3654_v20 }
0x2fbd   :  { %v3659_v13 = vpop.permute.xlu0 %3658 }
0x2fbe   :  { %3662 = vrot.lane.b32.xlu1 %v3656_v29, %s4606_s5  ;;  %v3665_v12 = vrot.slane %v3656_v29, 2  ;;  %s4574_s5 = scalar_lea.vmem %s3835_s23, 32 }
0x2fbf   :  { %p4575_p5 = scmp.ne.s32.totalorder %s3835_s23, %s4574_s5  ;;  %p4580_p7 = scmp.lt.s32.totalorder %s4574_s5, %s4574_s5 }
0x2fc0   :  { %3666 = vrot.lane.b32.xlu0 %v3665_v12, %s4607_s25 }
0x2fc1   :  { %p4581_p8 = por %p4580_p7, %p4579_p6 }
0x2fc3   :  { %p4582_p9 = pnand %p4581_p8, %p4575_p5 }
0x3030   :  { %v3663_v62 = vpop.permute.xlu1 %3662 }
0x3031   :  { %v3669_v3 = vsel %vm266_vm3, %v3659_v13, %v3663_v62 }
0x3032   :  { %v3667_v49 = vpop.permute.xlu0 %3666 }
0x3033   :  { %v3671_v63 = vsel %vm3670_vm5, %v3669_v3, %v3667_v49 }
0x3034   :  { %4419 = vmatmul.mubr.msk.f32.vlgmr.msra.gmra.mxu1 %vm3685_vm6, %v3671_v63 }
0x30f4   :  { %v3755_v46 = vpop.f32.mrf.mxu1 }
0x30f5   :  { %v3756_v47 = vadd.f32 %v3909_v45, %v3755_v46 }
0x30f6   :  { %v4420_v58 = vpop.f32.mrf.mxu1 }
0x30f7   :  { %v3800_v21 = vadd.f32 %v3798_v11, %v3756_v47 }
0x30f9   :  { %v3808_v4 = vrot.slane %v3800_v21, %v3807_v15 }
0x30fb   :  { %v3809_v56 = vcombine.high %v3808_v4, %v3808_v4  ;;  %v3816_v53 = vrot.slane %v3808_v4, %v3807_v15 }
0x30fd   :  { %v3823_v48 = vrot.slane %v3809_v56, %v3807_v15  ;;  %3827 = vst.msk [vmem:[#allocation6] sm:$0x1] %vm3826_vm8, %v3816_v53 }
0x30ff   :  { %3828 = vst.msk [vmem:[#allocation6 + $0x1] sm:$0x1] %vm3826_vm8, %v3823_v48 }
0x3100   :  { %4585 = shalt.err (!%p4582_p9)
}
0x3101   :  { %s4610_s12 = smov 1  }
0x3102   :  { %3840 = dma.vmem_to_hbm [thread:$0]  %s3835_s23, 32, %s5441_s16, [#allocation4], %s4604_s9, %s4604_s9, %s4610_s12  }
0x3103   :  { %4596 = dma.done.wait [#allocation4], 32  }
0x3104   :  { %4597 = vsyncadd [#allocation4], 4294967264 }
0x3105   :  { %3844 = vsyncpa [#allocation4], 1 }
0x3106   :  { %3845 = vsyncpa [#allocation5], 1 }

</bundles_post_ra>
